<compile_context>
chip_gen: v7x
topology: tpu7x:2x2x1
jax: 0.10.0
libtpu: 0.0.40
codegen_flags: <defaults>
</compile_context>

<pallas_src>
import functools

import jax
import jax.numpy as jnp
from jax.experimental import pallas as pl
from jax.experimental.pallas import tpu as pltpu

# wav2vec_large conv feature-extractor config: (out_channels, kernel, stride)
CONV_LAYERS = [(512, 10, 5), (512, 8, 4), (512, 4, 2), (512, 4, 2), (512, 4, 2),
               (512, 1, 1), (512, 1, 1)]
LOG_COMPRESSION = True     # x = log(|x| + 1) at the end of the feature extractor
GN_EPS = 1e-5
NEG_INF = -1e30            # bias for padded vocab lanes (exp underflows to 0)
# TODO(synk): exact extractor flags (skip_connections_feat / activation) live in the
# wav2vec_large.pt checkpoint args which cannot be loaded here; fairseq defaults used
# (skip_connections_feat=False, dropout is identity at inference).


# ----------------------------- kernel helpers -------------------------------

def _gn_relu(acc, gamma, beta):
    """Single-pass Fp32GroupNorm(num_groups=1) + affine + ReLU on an f32 tile.

    acc: (T, C) f32, gamma/beta: (1, C) f32.  Stats cover the whole (T, C) sample
    (including any zero-padded frames of shorter sequences, matching the
    padded-batch PyTorch forward).  One read of `acc` produces sum & sum-of-squares;
    the normalize/affine/ReLU is the only other full pass.
    """
    inv_n = 1.0 / float(acc.shape[0] * acc.shape[1])
    s1 = jnp.sum(acc)
    s2 = jnp.sum(acc * acc)
    mean = s1 * inv_n
    var = jnp.maximum(s2 * inv_n - mean * mean, 0.0)   # clamp f32 cancellation
    scale = jax.lax.rsqrt(var + GN_EPS)                # rsqrt -> EUP slot
    return jnp.maximum((acc - mean) * scale * gamma + beta, 0.0)


# ----------------------------- Pallas kernels -------------------------------

def _conv_gn_relu_kernel(x_ref, w_ref, g_ref, b_ref, o_ref, *, stride):
    """Fused Conv1d (strided-tap sum) + Fp32GroupNorm(1) + ReLU for one sample.

    x_ref: (T_in, C_in)      bf16  natural channel-last layout (no polyphase rewrite)
    w_ref: (K, C_in, C_out)  bf16  PyTorch (C_out, C_in, K) stored as (K, C_in, C_out)
    g_ref, b_ref: (1, C_out) f32   GroupNorm affine
    o_ref: (T_out, C_out)    bf16
    """
    k_taps = w_ref.shape[0]
    t_out, c_out = o_ref.shape

    if k_taps == 1:
        # k=1 conv (or pre-built layer-1 im2col patches): a single MXU matmul.
        acc = jnp.dot(x_ref[...], w_ref[0], preferred_element_type=jnp.float32)
    else:
        acc = jnp.zeros((t_out, c_out), jnp.float32)
        for k in range(k_taps):                              # static unroll, K <= 8
            # Tap k reads rows k, k+s, ..., k+(t_out-1)*s directly from the natural
            # layout: a static strided sublane load, full 512 lanes -> no im2col copy
            # and no wrapper-side transpose round trip through HBM.
            x_k = x_ref[pl.ds(k, t_out, stride=stride), :]   # (T_out, C_in)
            acc = acc + jnp.dot(x_k, w_ref[k], preferred_element_type=jnp.float32)

    o_ref[...] = _gn_relu(acc, g_ref[...], b_ref[...]).astype(o_ref.dtype)


def _tail_kernel(x_ref, w6_ref, g6_ref, b6_ref, w7_ref, g7_ref, b7_ref,
                 wh_ref, bh_ref, o_ref):
    """Fused tail for one sample: conv6(k=1)+GN+ReLU -> conv7(k=1)+GN+ReLU ->
    log-compression -> Linear(512, Vp) -> log_softmax over the padded vocab lanes.

    x_ref: (T, 512) bf16; w6/w7: (512, 512) bf16; wh: (512, Vp) bf16;
    g*/b*: (1, 512) f32; bh: (1, Vp) f32; o_ref: (T, Vp) f32.
    Padded vocab lanes carry zero weights and a -1e30 bias, so they never affect the
    max / normalizer and are sliced off outside the kernel.
    """
    h = jnp.dot(x_ref[...], w6_ref[...], preferred_element_type=jnp.float32)
    h = _gn_relu(h, g6_ref[...], b6_ref[...])
    h = jnp.dot(h.astype(jnp.bfloat16), w7_ref[...],
                preferred_element_type=jnp.float32)
    h = _gn_relu(h, g7_ref[...], b7_ref[...])
    if LOG_COMPRESSION:
        h = jnp.log(jnp.abs(h) + 1.0)                        # EUP log, f32
    logits = jnp.dot(h.astype(jnp.bfloat16), wh_ref[...],
                     preferred_element_type=jnp.float32) + bh_ref[...]
    m = jnp.max(logits, axis=-1, keepdims=True)
    z = logits - m
    lse = jnp.log(jnp.sum(jnp.exp(z), axis=-1, keepdims=True))
    o_ref[...] = z - lse


# ------------------------------- wrappers ------------------------------------

def conv_gn_relu(x, w, gamma, beta, stride):
    """x: (N, T_in, C_in) bf16, w: (K, C_in, C_out) bf16 -> (N, T_out, C_out) bf16."""
    n, t_in, c_in = x.shape
    k, _, c_out = w.shape
    t_out = (t_in - k) // stride + 1
    kernel = functools.partial(_conv_gn_relu_kernel, stride=stride)
    return pl.pallas_call(
        kernel,
        out_shape=jax.ShapeDtypeStruct((n, t_out, c_out), jnp.bfloat16),
        grid=(n,),
        in_specs=[
            pl.BlockSpec((None, t_in, c_in), lambda i: (i, 0, 0)),
            pl.BlockSpec((k, c_in, c_out), lambda i: (0, 0, 0)),
            pl.BlockSpec((1, c_out), lambda i: (0, 0)),
            pl.BlockSpec((1, c_out), lambda i: (0, 0)),
        ],
        out_specs=pl.BlockSpec((None, t_out, c_out), lambda i: (i, 0, 0)),
        compiler_params=pltpu.CompilerParams(
            dimension_semantics=("parallel",)),   # samples split across v7x TCs
    )(x, w, gamma, beta)


def tail_fused(x, w6, g6, b6, w7, g7, b7, wh, bh):
    """x: (N, T, 512) bf16 -> (N, T, Vp) f32 log-probs (vocab padded to Vp lanes)."""
    n, t, c = x.shape
    vp = wh.shape[1]
    return pl.pallas_call(
        _tail_kernel,
        out_shape=jax.ShapeDtypeStruct((n, t, vp), jnp.float32),
        grid=(n,),
        in_specs=[
            pl.BlockSpec((None, t, c), lambda i: (i, 0, 0)),
            pl.BlockSpec((c, c), lambda i: (0, 0)),
            pl.BlockSpec((1, c), lambda i: (0, 0)),
            pl.BlockSpec((1, c), lambda i: (0, 0)),
            pl.BlockSpec((c, c), lambda i: (0, 0)),
            pl.BlockSpec((1, c), lambda i: (0, 0)),
            pl.BlockSpec((1, c), lambda i: (0, 0)),
            pl.BlockSpec((c, vp), lambda i: (0, 0)),
            pl.BlockSpec((1, vp), lambda i: (0, 0)),
        ],
        out_specs=pl.BlockSpec((None, t, vp), lambda i: (i, 0, 0)),
        compiler_params=pltpu.CompilerParams(
            dimension_semantics=("parallel",)),
    )(x, w6, g6, b6, w7, g7, b7, wh, bh)


def waveform_to_patches(x, k, s):
    """x: (N, T) f32 raw waveform -> (N, T_out, K) bf16 im2col patches.

    Patches are tiny (K*2 bytes/frame) next to the 512-channel activations, so this
    one wrapper-side gather turns layer 1's lane-sparse 1-channel tap loop into a
    single MXU matmul (T_out, K) @ (K, 512) inside the fused conv kernel.
    """
    n, t = x.shape
    t_out = (t - k) // s + 1
    cols = [x[:, tap: tap + (t_out - 1) * s + 1: s] for tap in range(k)]
    return jnp.stack(cols, axis=-1).astype(jnp.bfloat16)


# --------------------------------- model -------------------------------------

def init_params(key, vocab_size):
    params = {"convs": [], "linear": {}}
    c_in = 1
    for (c_out, k, s) in CONV_LAYERS:
        key, k1 = jax.random.split(key)
        # PyTorch Conv1d weight is (C_out, C_in, K); stored here pre-transposed to the
        # TPU-friendly (K, C_in, C_out) layout and pre-cast to bf16 for the MXU.
        w = jax.random.normal(k1, (k, c_in, c_out), jnp.float32) * 0.05
        params["convs"].append({
            "w": w.astype(jnp.bfloat16),
            "gamma": jnp.ones((1, c_out), jnp.float32),
            "beta": jnp.zeros((1, c_out), jnp.float32),
        })
        c_in = c_out
    key, k1, k2 = jax.random.split(key, 3)
    params["linear"]["w"] = jax.random.normal(k1, (512, vocab_size), jnp.float32) * 0.05
    params["linear"]["b"] = jax.random.normal(k2, (vocab_size,), jnp.float32) * 0.05
    return params


def wav2vec_ctc_forward(params, inputs, targets=None):
    """inputs: (N, T) zero-padded raw waveform (float32).  Returns (L, N, V) log-probs."""
    if targets is not None:
        # TODO(synk): nn.CTCLoss (dynamic-programming alpha recursion) has no clean
        # Pallas mapping here; only the inference path (targets=None) is implemented.
        raise NotImplementedError("CTC loss branch not implemented")

    # ----- layer 1: im2col patches + fused matmul + GN + ReLU (k=1 kernel path) ----
    c1, k1, s1 = CONV_LAYERS[0]
    p1 = params["convs"][0]
    patches = waveform_to_patches(inputs, k1, s1)              # (N, T1, 10) bf16
    w1 = p1["w"].reshape(1, k1, c1)                            # (10,1,512) -> (1,10,512)
    x = conv_gn_relu(patches, w1, p1["gamma"], p1["beta"], stride=1)

    # ----- layers 2-5: fused strided-tap conv + GN + ReLU, natural (N,T,512) -------
    for li in range(1, 5):
        _, k, s = CONV_LAYERS[li]
        p = params["convs"][li]
        x = conv_gn_relu(x, p["w"], p["gamma"], p["beta"], stride=s)

    # ----- layers 6-7 + log-compression + Linear + log_softmax: one fused kernel ---
    p6, p7 = params["convs"][5], params["convs"][6]
    w = params["linear"]["w"]
    b = params["linear"]["b"]
    v = w.shape[1]
    v_pad = max(128, ((v + 127) // 128) * 128)   # lane-dense; do NOT over-pad to 256
    w_p = jnp.pad(w, ((0, 0), (0, v_pad - v))).astype(jnp.bfloat16)
    b_p = jnp.pad(b, (0, v_pad - v), constant_values=NEG_INF)[None, :]   # (1, Vp) f32

    logp = tail_fused(x, p6["w"][0], p6["gamma"], p6["beta"],
                      p7["w"][0], p7["gamma"], p7["beta"], w_p, b_p)     # (N, T, Vp)
    return jnp.transpose(logp[:, :, :v], (1, 0, 2))                      # (L, N, V)


# ---------------------------------- main --------------------------------------

if __name__ == "__main__":
    vocab_size = 32
    key = jax.random.PRNGKey(0)
    kp, kd = jax.random.split(key)
    params = init_params(kp, vocab_size)

    # Mimic the module's python-side padding: variable-length sequences, zero-padded.
    lengths = [1024, 896]
    max_len = max(lengths)
    kd1, kd2 = jax.random.split(kd)
    seqs = [jax.random.normal(k, (l,), jnp.float32)
            for k, l in zip([kd1, kd2], lengths)]
    inputs = jnp.stack([jnp.pad(s, (0, max_len - s.shape[0])) for s in seqs])  # (2, 1024)

    out = wav2vec_ctc_forward(params, inputs)        # (L, N, V) log-probs
    out = jax.block_until_ready(out)

    assert out.shape == (4, 2, vocab_size), out.shape
    # log_softmax rows must exponentiate-and-sum to 1
    assert bool(jnp.allclose(jnp.sum(jnp.exp(out), axis=-1), 1.0, atol=1e-3))
    print("KERNEL_OK")
</pallas_src>

<mosaic_0001>
module attributes {stable_mosaic.version = 11 : i64} {
  func.func @_conv_gn_relu_kernel(%arg0: i32, %arg1: memref<1x203x10xbf16, #tpu.memory_space<vmem>>, %arg2: memref<1x10x512xbf16, #tpu.memory_space<vmem>>, %arg3: memref<1x512xf32, #tpu.memory_space<vmem>>, %arg4: memref<1x512xf32, #tpu.memory_space<vmem>>, %arg5: memref<1x203x512xbf16, #tpu.memory_space<vmem>>) attributes {dimension_semantics = [#tpu.dimension_semantics<parallel>], iteration_bounds = array<i64: 2>, scalar_prefetch = 0 : i64, scratch_operands = 0 : i64, tpu.core_type = #tpu.core_type<tc>, window_params = [{transform_indices = @transform_0, window_bounds = array<i64: 1, 203, 10>}, {pipeline_mode = #tpu.pipeline_mode<synchronous>, transform_indices = @transform_1, window_bounds = array<i64: 1, 10, 512>}, {pipeline_mode = #tpu.pipeline_mode<synchronous>, transform_indices = @transform_2, window_bounds = array<i64: 1, 512>}, {pipeline_mode = #tpu.pipeline_mode<synchronous>, transform_indices = @transform_3, window_bounds = array<i64: 1, 512>}, {transform_indices = @transform_4, window_bounds = array<i64: 1, 203, 512>}]} {
    %c0 = arith.constant 0 : index
    %c0_0 = arith.constant 0 : index
    %c0_1 = arith.constant 0 : index
    %0 = vector.load %arg1[%c0, %c0_0, %c0_1] : memref<1x203x10xbf16, #tpu.memory_space<vmem>>, vector<1x203x10xbf16>
    %1 = vector.shape_cast %0 : vector<1x203x10xbf16> to vector<203x10xbf16>
    %c0_2 = arith.constant 0 : index
    %c0_3 = arith.constant 0 : index
    %c0_4 = arith.constant 0 : index
    %2 = vector.load %arg2[%c0_2, %c0_3, %c0_4] : memref<1x10x512xbf16, #tpu.memory_space<vmem>>, vector<1x10x512xbf16>
    %3 = vector.shape_cast %2 : vector<1x10x512xbf16> to vector<10x512xbf16>
    %cst = arith.constant dense<0.000000e+00> : vector<203x512xf32>
    %4 = tpu.matmul %1, %3, %cst {dimension_numbers = #tpu.dot_dimension_numbers<[1], [0], [0], [1], [0, 0, 1, 1], [], []>} : vector<203x10xbf16>, vector<10x512xbf16>, vector<203x512xf32> -> vector<203x512xf32>
    %c0_5 = arith.constant 0 : index
    %c0_6 = arith.constant 0 : index
    %5 = vector.load %arg3[%c0_5, %c0_6] : memref<1x512xf32, #tpu.memory_space<vmem>>, vector<1x512xf32>
    %c0_7 = arith.constant 0 : index
    %c0_8 = arith.constant 0 : index
    %6 = vector.load %arg4[%c0_7, %c0_8] : memref<1x512xf32, #tpu.memory_space<vmem>>, vector<1x512xf32>
    %7 = vector.shape_cast %4 : vector<203x512xf32> to vector<1x203x512xf32>
    %cst_9 = arith.constant dense<0.000000e+00> : vector<1xf32>
    %8 = vector.multi_reduction <add>, %7, %cst_9 [1, 2] : vector<1x203x512xf32> to vector<1xf32>
    %9 = vector.shape_cast %8 : vector<1xf32> to vector<1x1x1xf32>
    %10 = vector.extract %9[0, 0, 0] : f32 from vector<1x1x1xf32>
    %11 = arith.mulf %4, %4 : vector<203x512xf32>
    %12 = vector.shape_cast %11 : vector<203x512xf32> to vector<1x203x512xf32>
    %cst_10 = arith.constant dense<0.000000e+00> : vector<1xf32>
    %13 = vector.multi_reduction <add>, %12, %cst_10 [1, 2] : vector<1x203x512xf32> to vector<1xf32>
    %14 = vector.shape_cast %13 : vector<1xf32> to vector<1x1x1xf32>
    %15 = vector.extract %14[0, 0, 0] : f32 from vector<1x1x1xf32>
    %cst_11 = arith.constant 9.62130525E-6 : f32
    %16 = arith.mulf %10, %cst_11 : f32
    %cst_12 = arith.constant 9.62130525E-6 : f32
    %17 = arith.mulf %15, %cst_12 : f32
    %18 = arith.mulf %16, %16 : f32
    %19 = arith.subf %17, %18 : f32
    %cst_13 = arith.constant 0.000000e+00 : f32
    %20 = arith.maximumf %19, %cst_13 : f32
    %cst_14 = arith.constant 9.99999974E-6 : f32
    %21 = arith.addf %20, %cst_14 : f32
    %22 = math.rsqrt %21 : f32
    %23 = vector.broadcast %16 : f32 to vector<203x512xf32>
    %24 = arith.subf %4, %23 : vector<203x512xf32>
    %25 = vector.broadcast %22 : f32 to vector<203x512xf32>
    %26 = arith.mulf %24, %25 : vector<203x512xf32>
    %27 = vector.broadcast %5 : vector<1x512xf32> to vector<203x512xf32>
    %28 = arith.mulf %26, %27 : vector<203x512xf32>
    %29 = vector.broadcast %6 : vector<1x512xf32> to vector<203x512xf32>
    %30 = arith.addf %28, %29 : vector<203x512xf32>
    %cst_15 = arith.constant 0.000000e+00 : f32
    %31 = vector.broadcast %cst_15 : f32 to vector<203x512xf32>
    %32 = arith.maximumf %30, %31 : vector<203x512xf32>
    %33 = arith.truncf %32 : vector<203x512xf32> to vector<203x512xbf16>
    %c0_16 = arith.constant 0 : index
    %c0_17 = arith.constant 0 : index
    %c0_18 = arith.constant 0 : index
    %34 = vector.load %arg5[%c0_16, %c0_17, %c0_18] : memref<1x203x512xbf16, #tpu.memory_space<vmem>>, vector<1x203x512xbf16>
    %35 = vector.shape_cast %34 : vector<1x203x512xbf16> to vector<203x512xbf16>
    %36 = vector.shape_cast %33 : vector<203x512xbf16> to vector<1x203x512xbf16>
    tpu.vector_store %arg5[%c0_16, %c0_17, %c0_18], %36 {strides = array<i32>} : memref<1x203x512xbf16, #tpu.memory_space<vmem>>, vector<1x203x512xbf16>,
    return
  }
  func.func @transform_0(%arg0: i32) -> (i32, i32, i32) {
    %c0_i32 = arith.constant 0 : i32
    %c0_i32_0 = arith.constant 0 : i32
    %c0_i32_1 = arith.constant 0 : i32
    return %arg0, %c0_i32, %c0_i32_0 : i32, i32, i32
  }
  func.func @transform_1(%arg0: i32) -> (i32, i32, i32) {
    %c0_i32 = arith.constant 0 : i32
    %c0_i32_0 = arith.constant 0 : i32
    %c0_i32_1 = arith.constant 0 : i32
    %c0_i32_2 = arith.constant 0 : i32
    return %c0_i32, %c0_i32_0, %c0_i32_1 : i32, i32, i32
  }
  func.func @transform_2(%arg0: i32) -> (i32, i32) {
    %c0_i32 = arith.constant 0 : i32
    %c0_i32_0 = arith.constant 0 : i32
    %c0_i32_1 = arith.constant 0 : i32
    return %c0_i32, %c0_i32_0 : i32, i32
  }
  func.func @transform_3(%arg0: i32) -> (i32, i32) {
    %c0_i32 = arith.constant 0 : i32
    %c0_i32_0 = arith.constant 0 : i32
    %c0_i32_1 = arith.constant 0 : i32
    return %c0_i32, %c0_i32_0 : i32, i32
  }
  func.func @transform_4(%arg0: i32) -> (i32, i32, i32) {
    %c0_i32 = arith.constant 0 : i32
    %c0_i32_0 = arith.constant 0 : i32
    %c0_i32_1 = arith.constant 0 : i32
    return %arg0, %c0_i32, %c0_i32_0 : i32, i32, i32
  }
}

</mosaic_0001>

<bundles_post_ra>
// kernel: tpu_custom_call.1
= control target key start
LH: loop header
LB: loop body
LE: loop exit
PB: predicated region body
PF: predicated region fallthrough
CT: control target
= control target key end

     0   :  { %s2263_s15 = smov 0   ;;  %s4975_s0 = inlined_call_operand.vmem [shape: bf16[2,203,10], index: 0, kind: input, shape index: {}]   ;;  %s4976_s1 = inlined_call_operand.vmem [shape: bf16[1,10,512], index: 1, kind: input, shape index: {}]   ;;  %s4977_s2 = inlined_call_operand.vmem [shape: f32[1,512], index: 2, kind: input, shape index: {}]   ;;  %s4978_s3 = inlined_call_operand.vmem [shape: f32[1,512], index: 3, kind: input, shape index: {}]   ;;  %s4979_s4 = inlined_call_operand.vmem [shape: bf16[2,203,512], index: 4, kind: output, shape index: {}]  }
   0x1 LB: > { %s2031_s16 = sadd.s32 4294967295, %s2234_s15   ;;  %p2035_p0 = scmp.ge.s32.totalorder %s2234_s15, 1  ;;  %s2234_s15 = sphi %s2263_s15, %s14_s15  }
   0x2   : > { %p162_p1 = scmp.lt.s32.totalorder %s2234_s15, 3 }
   0x4   : > { %p163_p2 = pnand %p2035_p0, %p162_p1 }
   0x6   : > { %166 = sbr.rel (%p163_p2) target bundleno = 923 (0x39b), region = 36 }
   0xd   : > { %v2207_v0 = vld [vmem:[%s4976_s1 + $0x4] ss:$16 sps:$4 sm:$0x1f]   ;;  %vm350_vm0 = vcmask 1044480   ;;  %p188_p3 = scmp.lt.s32.totalorder %s2031_s16, 1  ;;  %v2236_v3 = vmov 0  }
   0xe   : > { %2055 = vmatprep.subr.msk.bf16.mxu0 %vm350_vm0, %v2207_v0  ;;  %v2209_v1 = vld [vmem:[%s4976_s1 + $0xc] ss:$16 sps:$4 sm:$0x1f]   ;;  %v2211_v2 = vld [vmem:[%s4976_s1] ss:$16 sps:$4 sm:$0x1f]   ;;  %395 = vmatprep.mubr.bf16.mxu0 %v2236_v3 }
   0xf   : > { %v2212_v4 = vld [vmem:[%s4976_s1 + $0x8] ss:$16 sps:$4 sm:$0x1f]   ;;  %558 = vmatprep.mubr.bf16.mxu1 %v2236_v3  ;;  %s6015_s16 = smov (!%p188_p3, %s2031_s16), 1  ;;  %2069 = vmatprep.subr.msk.bf16.mxu1 %vm350_vm0, %v2209_v1  ;;  %v352_v5 = vsel %vm350_vm0, %v2211_v2, 0  ;;  %vm310_vm1 = vcmask 80896  }
  0x10   : > { %364 = vmatpush1.bf16.msra.mxu0 %v352_v5  ;;  %v358_v6 = vsel %vm350_vm0, %v2212_v4, 0  ;;  %s2189_s25 = smul.u32 104, %s6015_s16  ;;  %vm790_vm2 = vcmask 1042432   ;;  %s2237_s9 = smov 0.0   ;;  %vm1963_vm3 = vcmask 1041408   ;;  %vm1966_vm5 = vcmask 1045508  }
  0x11   : > { %527 = vmatpush1.bf16.msra.mxu1 %v358_v6  ;;  %s2190_s19 = smul.u32 416, %s6015_s16  ;;  %vm1964_vm4 = vsmask.f32 1280  ;;  %vm1967_vm6 = vsmask.f32 5376 }
  0x12   : > { %s2291_s28 = scalar_lea.vmem %s4975_s0, %s2189_s25  ;;  %vm4838_vm7 = vmand %vm1963_vm3, %vm1964_vm4 }
  0x13   : > { %v2213_v7 = vld [vmem:[%s2291_s28] sm:$0xff]   ;;  %v2214_v8 = vld [vmem:[%s2291_s28 + $0x8] sm:$0xff]   ;;  %v2215_v9 = vld [vmem:[%s2291_s28 + $0x10] sm:$0xff]   ;;  %s4678_s21 = scalar_lea.vmem %s4979_s4, %s2190_s19 }
  0x14   : > { %2056 = vmatmul.mubr.msk.bf16.vlgmr.msra.gmra.mrb[0].mxu0 %vm310_vm1, %v2213_v7  ;;  %2070 = vmatmul.mubr.msk.bf16.vlgmr.msra.gmra.mrb[0].mxu1 %vm310_vm1, %v2213_v7  ;;  %v2216_v10 = vld [vmem:[%s2291_s28 + $0x18] sm:$0xff]   ;;  %v2217_v11 = vld [vmem:[%s2291_s28 + $0x20] sm:$0xff]   ;;  %v2218_v12 = vld [vmem:[%s2291_s28 + $0x28] sm:$0xff]  }
  0x15   : > { %405 = vmatprep.mubr.bf16.mxu0 %v2236_v3  ;;  %568 = vmatprep.mubr.bf16.mxu1 %v2236_v3  ;;  %v2219_v13 = vld [vmem:[%s2291_s28 + $0x30] sm:$0xff]   ;;  %v2220_v14 = vld [vmem:[%s2291_s28 + $0x38] sm:$0xff]   ;;  %v2221_v15 = vld [vmem:[%s2291_s28 + $0x40] sm:$0xff]  }
  0x16   : > { %v2222_v16 = vld [vmem:[%s2291_s28 + $0x48] sm:$0xff]   ;;  %v2223_v17 = vld [vmem:[%s2291_s28 + $0x50] sm:$0xff]   ;;  %v2224_v18 = vld [vmem:[%s2291_s28 + $0x58] sm:$0xff]  }
  0x17   : > { %v2225_v19 = vld [vmem:[%s2291_s28 + $0x60] sm:$0x3f]   ;;  %vm4864_vm8 = vmand %vm1966_vm5, %vm1967_vm6 }
  0x18   : > { %vm1969_vm9 = vmor %vm4864_vm8, %vm4838_vm7 }
  0x1c   : > { %2057 = vmatmul.mubr.msk.bf16.gmra.mrb[4].mxu0 %vm310_vm1, %v2214_v8  ;;  %2071 = vmatmul.mubr.msk.bf16.gmra.mrb[4].mxu1 %vm310_vm1, %v2214_v8 }
  0x1d   : > { %415 = vmatprep.mubr.bf16.mxu0 %v2236_v3  ;;  %578 = vmatprep.mubr.bf16.mxu1 %v2236_v3 }
  0x24   : > { %2058 = vmatmul.mubr.msk.bf16.gmra.mrb[8].mxu0 %vm310_vm1, %v2215_v9  ;;  %2072 = vmatmul.mubr.msk.bf16.gmra.mrb[8].mxu1 %vm310_vm1, %v2215_v9 }
  0x25   : > { %425 = vmatprep.mubr.bf16.mxu0 %v2236_v3  ;;  %588 = vmatprep.mubr.bf16.mxu1 %v2236_v3 }
  0x2c   : > { %2059 = vmatmul.mubr.msk.bf16.gmra.mrb[12].mxu0 %vm310_vm1, %v2216_v10  ;;  %2073 = vmatmul.mubr.msk.bf16.gmra.mrb[12].mxu1 %vm310_vm1, %v2216_v10 }
  0x2d   : > { %435 = vmatprep.mubr.bf16.mxu0 %v2236_v3  ;;  %598 = vmatprep.mubr.bf16.mxu1 %v2236_v3 }
  0x34   : > { %2060 = vmatmul.mubr.msk.bf16.gmra.mrb[16].mxu0 %vm310_vm1, %v2217_v11  ;;  %2074 = vmatmul.mubr.msk.bf16.gmra.mrb[16].mxu1 %vm310_vm1, %v2217_v11 }
  0x35   : > { %445 = vmatprep.mubr.bf16.mxu0 %v2236_v3  ;;  %608 = vmatprep.mubr.bf16.mxu1 %v2236_v3 }
  0x3c   : > { %2061 = vmatmul.mubr.msk.bf16.gmra.mrb[20].mxu0 %vm310_vm1, %v2218_v12  ;;  %2075 = vmatmul.mubr.msk.bf16.gmra.mrb[20].mxu1 %vm310_vm1, %v2218_v12 }
  0x3d   : > { %455 = vmatprep.mubr.bf16.mxu0 %v2236_v3  ;;  %618 = vmatprep.mubr.bf16.mxu1 %v2236_v3 }
  0x44   : > { %2062 = vmatmul.mubr.msk.bf16.gmra.mrb[24].mxu0 %vm310_vm1, %v2219_v13  ;;  %2076 = vmatmul.mubr.msk.bf16.gmra.mrb[24].mxu1 %vm310_vm1, %v2219_v13 }
  0x45   : > { %465 = vmatprep.mubr.bf16.mxu0 %v2236_v3  ;;  %628 = vmatprep.mubr.bf16.mxu1 %v2236_v3 }
  0x4c   : > { %2063 = vmatmul.mubr.msk.bf16.gmra.mrb[28].mxu0 %vm310_vm1, %v2220_v14  ;;  %2077 = vmatmul.mubr.msk.bf16.gmra.mrb[28].mxu1 %vm310_vm1, %v2220_v14 }
  0x4d   : > { %475 = vmatprep.mubr.bf16.mxu0 %v2236_v3  ;;  %638 = vmatprep.mubr.bf16.mxu1 %v2236_v3 }
  0x54   : > { %2064 = vmatmul.mubr.msk.bf16.gmra.mrb[32].mxu0 %vm310_vm1, %v2221_v15  ;;  %2078 = vmatmul.mubr.msk.bf16.gmra.mrb[32].mxu1 %vm310_vm1, %v2221_v15 }
  0x55   : > { %485 = vmatprep.mubr.bf16.mxu0 %v2236_v3  ;;  %648 = vmatprep.mubr.bf16.mxu1 %v2236_v3 }
  0x5c   : > { %2065 = vmatmul.mubr.msk.bf16.gmra.mrb[36].mxu0 %vm310_vm1, %v2222_v16  ;;  %2079 = vmatmul.mubr.msk.bf16.gmra.mrb[36].mxu1 %vm310_vm1, %v2222_v16 }
  0x5d   : > { %495 = vmatprep.mubr.bf16.mxu0 %v2236_v3  ;;  %658 = vmatprep.mubr.bf16.mxu1 %v2236_v3 }
  0x64   : > { %2066 = vmatmul.mubr.msk.bf16.gmra.mrb[40].mxu0 %vm310_vm1, %v2223_v17  ;;  %2080 = vmatmul.mubr.msk.bf16.gmra.mrb[40].mxu1 %vm310_vm1, %v2223_v17 }
  0x65   : > { %505 = vmatprep.mubr.bf16.mxu0 %v2236_v3  ;;  %668 = vmatprep.mubr.bf16.mxu1 %v2236_v3 }
  0x6c   : > { %2067 = vmatmul.mubr.msk.bf16.gmra.mrb[44].mxu0 %vm310_vm1, %v2224_v18  ;;  %2081 = vmatmul.mubr.msk.bf16.gmra.mrb[44].mxu1 %vm310_vm1, %v2224_v18 }
  0x6d   : > { %515 = vmatprep.mubr.bf16.mxu0 %v2236_v3  ;;  %678 = vmatprep.mubr.bf16.mxu1 %v2236_v3 }
  0x74   : > { %2068 = vmatmul.mubr.msk.bf16.gmra.mrb[48].mxu0 %vm310_vm1, %v2225_v19  ;;  %2082 = vmatmul.mubr.msk.bf16.gmra.mrb[48].mxu1 %vm310_vm1, %v2225_v19 }
  0xe7   : > { %v2356_v20 = vpop.f32.mrb[0].mxu0  ;;  %v2358_v21 = vpop.f32.mrb[0].mxu1 }
  0xe8   : > { %5193 = vst [vmem:[#allocation2_spill] sm:$0xff] %v2356_v20  ;;  %5194 = vst [vmem:[#allocation3_spill] sm:$0xff] %v2358_v21  ;;  %v808_v22 = vmul.f32 %v2356_v20, %v2356_v20  ;;  %v2362_v23 = vpop.f32.mrb[1].mxu0  ;;  %v2364_v24 = vpop.f32.mrb[1].mxu1  ;;  %v810_v25 = vmul.f32 %v2358_v21, %v2358_v21 }
  0xe9   : > { %5195 = vst [vmem:[#allocation4_spill] sm:$0xff] %v2362_v23  ;;  %5196 = vst [vmem:[#allocation5_spill] sm:$0xff] %v2364_v24  ;;  %v691_v26 = vadd.f32 %v2362_v23, %v2356_v20  ;;  %v809_v27 = vmul.f32 %v2362_v23, %v2362_v23  ;;  %v2372_v28 = vpop.f32.mrb[2].mxu0  ;;  %v2374_v29 = vpop.f32.mrb[2].mxu1  ;;  %v811_v36 = vmul.f32 %v2364_v24, %v2364_v24 }
  0xea   : > { %5197 = vst [vmem:[#allocation6_spill] sm:$0xff] %v2372_v28  ;;  %5198 = vst [vmem:[#allocation7_spill] sm:$0xff] %v2374_v29  ;;  %v2376_v30 = vpop.f32.mrb[3].mxu0  ;;  %v2378_v31 = vpop.f32.mrb[3].mxu1  ;;  %v812_v39 = vmul.f32 %v2372_v28, %v2372_v28  ;;  %v814_v51 = vmul.f32 %v2374_v29, %v2374_v29 }
  0xeb   : > { %5199 = vst [vmem:[#allocation8_spill] sm:$0xff] %v2376_v30  ;;  %5200 = vst [vmem:[#allocation9_spill] sm:$0xff] %v2378_v31  ;;  %v692_v32 = vadd.f32 %v691_v26, %v2358_v21  ;;  %v912_v33 = vadd.f32 %v809_v27, %v808_v22  ;;  %v813_v46 = vmul.f32 %v2376_v30, %v2376_v30 }
  0xec   : > { %v815_v56 = vmul.f32 %v2378_v31, %v2378_v31 }
  0xed   : > { %v913_v34 = vadd.f32 %v912_v33, %v810_v25  ;;  %v693_v35 = vadd.f32 %v692_v32, %v2364_v24 }
  0xef   : > { %v914_v37 = vadd.f32 %v913_v34, %v811_v36  ;;  %v694_v38 = vadd.f32 %v693_v35, %v2372_v28  ;;  %v2387_v40 = vpop.f32.mrb[4].mxu0  ;;  %v2389_v41 = vpop.f32.mrb[4].mxu1 }
  0xf0   : > { %5201 = vst [vmem:[#allocation10_spill] sm:$0xff] %v2387_v40  ;;  %5202 = vst [vmem:[#allocation11_spill] sm:$0xff] %v2389_v41  ;;  %v2391_v42 = vpop.f32.mrb[5].mxu0  ;;  %v2393_v43 = vpop.f32.mrb[5].mxu1  ;;  %v816_v57 = vmul.f32 %v2387_v40, %v2387_v40  ;;  %v818_v3 = vmul.f32 %v2389_v41, %v2389_v41 }
  0xf1   : > { %5203 = vst [vmem:[#allocation12_spill] sm:$0xff] %v2391_v42  ;;  %5204 = vst [vmem:[#allocation13_spill] sm:$0xff] %v2393_v43  ;;  %v915_v44 = vadd.f32 %v914_v37, %v812_v39  ;;  %v695_v45 = vadd.f32 %v694_v38, %v2376_v30  ;;  %v2398_v47 = vpop.f32.mrb[6].mxu0  ;;  %v2400_v48 = vpop.f32.mrb[6].mxu1  ;;  %v817_v2 = vmul.f32 %v2391_v42, %v2391_v42 }
  0xf2   : > { %5205 = vst [vmem:[#allocation14_spill] sm:$0xff] %v2398_v47  ;;  %5206 = vst [vmem:[#allocation15_spill] sm:$0xff] %v2400_v48  ;;  %v2402_v49 = vpop.f32.mrb[7].mxu0  ;;  %v2404_v50 = vpop.f32.mrb[7].mxu1  ;;  %v819_v12 = vmul.f32 %v2393_v43, %v2393_v43  ;;  %v820_v13 = vmul.f32 %v2398_v47, %v2398_v47  ;;  %v822_v37 = vmul.f32 %v2400_v48, %v2400_v48 }
  0xf3   : > { %5207 = vst [vmem:[#allocation16_spill] sm:$0xff] %v2402_v49  ;;  %5208 = vst [vmem:[#allocation17_spill] sm:$0xff] %v2404_v50  ;;  %v696_v52 = vadd.f32 %v695_v45, %v2374_v29  ;;  %v916_v53 = vadd.f32 %v915_v44, %v813_v46  ;;  %v821_v22 = vmul.f32 %v2402_v49, %v2402_v49 }
  0xf4   : > { %v823_v44 = vmul.f32 %v2404_v50, %v2404_v50 }
  0xf5   : > { %v917_v54 = vadd.f32 %v916_v53, %v814_v51  ;;  %v697_v55 = vadd.f32 %v696_v52, %v2378_v31 }
  0xf7   : > { %v918_v58 = vadd.f32 %v917_v54, %v815_v56  ;;  %v698_v59 = vadd.f32 %v697_v55, %v2387_v40  ;;  %v2415_v60 = vpop.f32.mrb[8].mxu0  ;;  %v2417_v61 = vpop.f32.mrb[8].mxu1 }
  0xf8   : > { %5209 = vst [vmem:[#allocation18_spill] sm:$0xff] %v2415_v60  ;;  %5210 = vst [vmem:[#allocation19_spill] sm:$0xff] %v2417_v61  ;;  %v2419_v62 = vpop.f32.mrb[9].mxu0  ;;  %v2421_v63 = vpop.f32.mrb[9].mxu1  ;;  %v824_v45 = vmul.f32 %v2415_v60, %v2415_v60 }
  0xf9   : > { %5211 = vst [vmem:[#allocation20_spill] sm:$0xff] %v2419_v62  ;;  %5212 = vst [vmem:[#allocation21_spill] sm:$0xff] %v2421_v63  ;;  %v919_v0 = vadd.f32 %v918_v58, %v816_v57  ;;  %v699_v1 = vadd.f32 %v698_v59, %v2391_v42  ;;  %v2428_v4 = vpop.f32.mrb[10].mxu0  ;;  %v2430_v5 = vpop.f32.mrb[10].mxu1  ;;  %v825_v58 = vmul.f32 %v2419_v62, %v2419_v62 }
  0xfa   : > { %5213 = vst [vmem:[#allocation22_spill] sm:$0xff] %v2428_v4  ;;  %5214 = vst [vmem:[#allocation23_spill] sm:$0xff] %v2430_v5  ;;  %v2432_v6 = vpop.f32.mrb[11].mxu0  ;;  %v2434_v7 = vpop.f32.mrb[11].mxu1  ;;  %v826_v59 = vmul.f32 %v2417_v61, %v2417_v61 }
  0xfb   : > { %5215 = vst [vmem:[#allocation24_spill] sm:$0xff] %v2432_v6  ;;  %5216 = vst [vmem:[#allocation25_spill] sm:$0xff] %v2434_v7  ;;  %v920_v8 = vadd.f32 %v919_v0, %v817_v2  ;;  %v700_v9 = vadd.f32 %v699_v1, %v2389_v41 }
  0xfd   : > { %v921_v10 = vadd.f32 %v920_v8, %v818_v3  ;;  %v701_v11 = vadd.f32 %v700_v9, %v2393_v43 }
  0xff   : > { %v702_v14 = vadd.f32 %v701_v11, %v2398_v47  ;;  %v922_v15 = vadd.f32 %v921_v10, %v819_v12  ;;  %v2443_v16 = vpop.f32.mrb[12].mxu0  ;;  %v2445_v17 = vpop.f32.mrb[12].mxu1  ;;  %v827_v12 = vmul.f32 %v2421_v63, %v2421_v63 }
 0x100   : > { %5217 = vst [vmem:[#allocation26_spill] sm:$0xff] %v2443_v16  ;;  %5218 = vst [vmem:[#allocation27_spill] sm:$0xff] %v2445_v17  ;;  %v2447_v18 = vpop.f32.mrb[13].mxu0  ;;  %v2449_v19 = vpop.f32.mrb[13].mxu1 }
 0x101   : > { %5219 = vst [vmem:[#allocation28_spill] sm:$0xff] %v2447_v18  ;;  %5220 = vst [vmem:[#allocation29_spill] sm:$0xff] %v2449_v19  ;;  %v703_v25 = vadd.f32 %v702_v14, %v2402_v49  ;;  %v923_v26 = vadd.f32 %v922_v15, %v820_v13  ;;  %v2454_v27 = vpop.f32.mrb[14].mxu0  ;;  %v2456_v32 = vpop.f32.mrb[14].mxu1  ;;  %v828_v13 = vmul.f32 %v2428_v4, %v2428_v4 }
 0x102   : > { %5221 = vst [vmem:[#allocation30_spill] sm:$0xff] %v2454_v27  ;;  %5222 = vst [vmem:[#allocation31_spill] sm:$0xff] %v2456_v32  ;;  %v2458_v33 = vpop.f32.mrb[15].mxu0  ;;  %v2460_v34 = vpop.f32.mrb[15].mxu1 }
 0x103   : > { %5223 = vst [vmem:[#allocation32_spill] sm:$0xff] %v2458_v33  ;;  %5224 = vst [vmem:[#allocation33_spill] sm:$0xff] %v2460_v34  ;;  %v924_v35 = vadd.f32 %v923_v26, %v821_v22  ;;  %v704_v36 = vadd.f32 %v703_v25, %v2400_v48 }
 0x105   : > { %v925_v38 = vadd.f32 %v924_v35, %v822_v37  ;;  %v705_v39 = vadd.f32 %v704_v36, %v2404_v50  ;;  %v829_v36 = vmul.f32 %v2432_v6, %v2432_v6 }
 0x107   : > { %v926_v46 = vadd.f32 %v925_v38, %v823_v44  ;;  %v706_v51 = vadd.f32 %v705_v39, %v2415_v60  ;;  %v2471_v52 = vpop.f32.mrb[16].mxu0  ;;  %v2473_v53 = vpop.f32.mrb[16].mxu1 }
 0x108   : > { %5225 = vst [vmem:[#allocation34_spill] sm:$0xff] %v2471_v52  ;;  %5226 = vst [vmem:[#allocation35_spill] sm:$0xff] %v2473_v53  ;;  %v2475_v54 = vpop.f32.mrb[17].mxu0  ;;  %v2477_v55 = vpop.f32.mrb[17].mxu1 }
 0x109   : > { %5227 = vst [vmem:[#allocation36_spill] sm:$0xff] %v2475_v54  ;;  %5228 = vst [vmem:[#allocation37_spill] sm:$0xff] %v2477_v55  ;;  %v927_v56 = vadd.f32 %v926_v46, %v824_v45  ;;  %v707_v57 = vadd.f32 %v706_v51, %v2419_v62  ;;  %v2484_v0 = vpop.f32.mrb[18].mxu0  ;;  %v2486_v1 = vpop.f32.mrb[18].mxu1 }
 0x10a   : > { %5229 = vst [vmem:[#allocation38_spill] sm:$0xff] %v2484_v0  ;;  %5230 = vst [vmem:[#allocation39_spill] sm:$0xff] %v2486_v1  ;;  %v2488_v2 = vpop.f32.mrb[19].mxu0  ;;  %v2490_v3 = vpop.f32.mrb[19].mxu1 }
 0x10b   : > { %5231 = vst [vmem:[#allocation40_spill] sm:$0xff] %v2488_v2  ;;  %5232 = vst [vmem:[#allocation41_spill] sm:$0xff] %v2490_v3  ;;  %v928_v8 = vadd.f32 %v927_v56, %v825_v58  ;;  %v708_v9 = vadd.f32 %v707_v57, %v2417_v61  ;;  %v830_v57 = vmul.f32 %v2430_v5, %v2430_v5 }
 0x10d   : > { %v929_v10 = vadd.f32 %v928_v8, %v826_v59  ;;  %v709_v11 = vadd.f32 %v708_v9, %v2421_v63  ;;  %v831_v8 = vmul.f32 %v2434_v7, %v2434_v7  ;;  %v832_v9 = vmul.f32 %v2443_v16, %v2443_v16 }
 0x10f   : > { %v710_v14 = vadd.f32 %v709_v11, %v2428_v4  ;;  %v930_v15 = vadd.f32 %v929_v10, %v827_v12  ;;  %v2499_v22 = vpop.f32.mrb[20].mxu0  ;;  %v2501_v25 = vpop.f32.mrb[20].mxu1 }
 0x110   : > { %5233 = vst [vmem:[#allocation42_spill] sm:$0xff] %v2499_v22  ;;  %5234 = vst [vmem:[#allocation43_spill] sm:$0xff] %v2501_v25  ;;  %v2503_v26 = vpop.f32.mrb[21].mxu0  ;;  %v2505_v35 = vpop.f32.mrb[21].mxu1 }
 0x111   : > { %5235 = vst [vmem:[#allocation44_spill] sm:$0xff] %v2503_v26  ;;  %5236 = vst [vmem:[#allocation45_spill] sm:$0xff] %v2505_v35  ;;  %v711_v37 = vadd.f32 %v710_v14, %v2432_v6  ;;  %v931_v38 = vadd.f32 %v930_v15, %v828_v13  ;;  %v2510_v39 = vpop.f32.mrb[22].mxu0  ;;  %v2512_v44 = vpop.f32.mrb[22].mxu1 }
 0x112   : > { %5237 = vst [vmem:[#allocation46_spill] sm:$0xff] %v2510_v39  ;;  %5238 = vst [vmem:[#allocation47_spill] sm:$0xff] %v2512_v44  ;;  %v2514_v45 = vpop.f32.mrb[23].mxu0  ;;  %v2516_v46 = vpop.f32.mrb[23].mxu1 }
 0x113   : > { %5239 = vst [vmem:[#allocation48_spill] sm:$0xff] %v2514_v45  ;;  %5240 = vst [vmem:[#allocation49_spill] sm:$0xff] %v2516_v46  ;;  %v932_v51 = vadd.f32 %v931_v38, %v829_v36  ;;  %v712_v56 = vadd.f32 %v711_v37, %v2430_v5  ;;  %v833_v38 = vmul.f32 %v2447_v18, %v2447_v18 }
 0x115   : > { %v933_v58 = vadd.f32 %v932_v51, %v830_v57  ;;  %v713_v59 = vadd.f32 %v712_v56, %v2434_v7  ;;  %v834_v51 = vmul.f32 %v2445_v17, %v2445_v17 }
 0x117   : > { %v934_v10 = vadd.f32 %v933_v58, %v831_v8  ;;  %v714_v11 = vadd.f32 %v713_v59, %v2443_v16  ;;  %v2527_v12 = vpop.f32.mrb[24].mxu0  ;;  %v2529_v13 = vpop.f32.mrb[24].mxu1 }
 0x118   : > { %5241 = vst [vmem:[#allocation50_spill] sm:$0xff] %v2527_v12  ;;  %v2531_v14 = vpop.f32.mrb[25].mxu0  ;;  %v2533_v15 = vpop.f32.mrb[25].mxu1 }
 0x119   : > { %5242 = vst [vmem:[#allocation51_spill] sm:$0xff] %v2531_v14  ;;  %5243 = vst [vmem:[#allocation52_spill] sm:$0xff] %v2533_v15  ;;  %v935_v36 = vadd.f32 %v934_v10, %v832_v9  ;;  %v715_v37 = vadd.f32 %v714_v11, %v2447_v18  ;;  %v2540_v56 = vpop.f32.mrb[26].mxu0  ;;  %v2542_v57 = vpop.f32.mrb[26].mxu1  ;;  %v835_v11 = vmul.f32 %v2449_v19, %v2449_v19 }
 0x11a   : > { %v2544_v58 = vpop.f32.mrb[27].mxu0  ;;  %v2546_v59 = vpop.f32.mrb[27].mxu1  ;;  %v836_v18 = vmul.f32 %v2454_v27, %v2454_v27 }
 0x11b   : > { %v936_v8 = vadd.f32 %v935_v36, %v833_v38  ;;  %v716_v16 = vadd.f32 %v715_v37, %v2445_v17 }
 0x11d   : > { %v937_v9 = vadd.f32 %v936_v8, %v834_v51  ;;  %v717_v10 = vadd.f32 %v716_v16, %v2449_v19  ;;  %v837_v16 = vmul.f32 %v2458_v33, %v2458_v33  ;;  %v838_v19 = vmul.f32 %v2456_v32, %v2456_v32 }
 0x11f   : > { %v718_v7 = vadd.f32 %v717_v10, %v2454_v27  ;;  %v938_v5 = vadd.f32 %v937_v9, %v835_v11  ;;  %v2555_v6 = vpop.f32.mrb[28].mxu0  ;;  %v2557_v4 = vpop.f32.mrb[28].mxu1 }
 0x120   : > { %v2559_v63 = vpop.f32.mrb[29].mxu0  ;;  %v2561_v36 = vpop.f32.mrb[29].mxu1 }
 0x121   : > { %v719_v37 = vadd.f32 %v718_v7, %v2458_v33  ;;  %v939_v38 = vadd.f32 %v938_v5, %v836_v18  ;;  %v2566_v51 = vpop.f32.mrb[30].mxu0  ;;  %v2568_v8 = vpop.f32.mrb[30].mxu1  ;;  %v839_v5 = vmul.f32 %v2460_v34, %v2460_v34  ;;  %v840_v7 = vmul.f32 %v2471_v52, %v2471_v52 }
 0x122   : > { %v2570_v10 = vpop.f32.mrb[31].mxu0  ;;  %v2572_v9 = vpop.f32.mrb[31].mxu1 }
 0x123   : > { %v940_v11 = vadd.f32 %v939_v38, %v837_v16  ;;  %v720_v27 = vadd.f32 %v719_v37, %v2456_v32 }
 0x125   : > { %v941_v17 = vadd.f32 %v940_v11, %v838_v19  ;;  %v721_v61 = vadd.f32 %v720_v27, %v2460_v34  ;;  %v841_v11 = vmul.f32 %v2475_v54, %v2475_v54  ;;  %v842_v34 = vmul.f32 %v2473_v53, %v2473_v53 }
 0x127   : > { %v942_v18 = vadd.f32 %v941_v17, %v839_v5  ;;  %v722_v33 = vadd.f32 %v721_v61, %v2471_v52  ;;  %v2583_v62 = vpop.f32.mrb[32].mxu0  ;;  %v2585_v16 = vpop.f32.mrb[32].mxu1 }
 0x128   : > { %5244 = vst [vmem:[#allocation53_spill] sm:$0xff] %v2585_v16  ;;  %v2587_v37 = vpop.f32.mrb[33].mxu0  ;;  %v2589_v38 = vpop.f32.mrb[33].mxu1 }
 0x129   : > { %v943_v19 = vadd.f32 %v942_v18, %v840_v7  ;;  %v723_v27 = vadd.f32 %v722_v33, %v2475_v54  ;;  %v2596_v17 = vpop.f32.mrb[34].mxu0  ;;  %v2598_v61 = vpop.f32.mrb[34].mxu1  ;;  %v843_v18 = vmul.f32 %v2477_v55, %v2477_v55  ;;  %v844_v54 = vmul.f32 %v2484_v0, %v2484_v0 }
 0x12a   : > { %v2600_v5 = vpop.f32.mrb[35].mxu0  ;;  %v2602_v52 = vpop.f32.mrb[35].mxu1 }
 0x12b   : > { %v944_v32 = vadd.f32 %v943_v19, %v841_v11  ;;  %v724_v60 = vadd.f32 %v723_v27, %v2473_v53 }
 0x12d   : > { %v945_v7 = vadd.f32 %v944_v32, %v842_v34  ;;  %v725_v33 = vadd.f32 %v724_v60, %v2477_v55  ;;  %v845_v60 = vmul.f32 %v2488_v2, %v2488_v2  ;;  %v846_v55 = vmul.f32 %v2486_v1, %v2486_v1 }
 0x12f   : > { %v726_v50 = vadd.f32 %v725_v33, %v2484_v0  ;;  %v946_v48 = vadd.f32 %v945_v7, %v843_v18  ;;  %v2611_v49 = vpop.f32.mrb[36].mxu0  ;;  %v2613_v47 = vpop.f32.mrb[36].mxu1 }
 0x130   : > { %v2615_v43 = vpop.f32.mrb[37].mxu0  ;;  %v2617_v19 = vpop.f32.mrb[37].mxu1 }
 0x131   : > { %v727_v32 = vadd.f32 %v726_v50, %v2488_v2  ;;  %v947_v34 = vadd.f32 %v946_v48, %v844_v54  ;;  %v2622_v27 = vpop.f32.mrb[38].mxu0  ;;  %v2624_v11 = vpop.f32.mrb[38].mxu1  ;;  %v847_v48 = vmul.f32 %v2490_v3, %v2490_v3  ;;  %v848_v50 = vmul.f32 %v2499_v22, %v2499_v22 }
 0x132   : > { %v2626_v33 = vpop.f32.mrb[39].mxu0  ;;  %v2628_v7 = vpop.f32.mrb[39].mxu1 }
 0x133   : > { %v948_v18 = vadd.f32 %v947_v34, %v845_v60  ;;  %v728_v0 = vadd.f32 %v727_v32, %v2486_v1 }
 0x135   : > { %v949_v53 = vadd.f32 %v948_v18, %v846_v55  ;;  %v729_v41 = vadd.f32 %v728_v0, %v2490_v3  ;;  %v849_v18 = vmul.f32 %v2503_v26, %v2503_v26  ;;  %v850_v3 = vmul.f32 %v2501_v25, %v2501_v25 }
 0x137   : > { %v950_v54 = vadd.f32 %v949_v53, %v847_v48  ;;  %v730_v2 = vadd.f32 %v729_v41, %v2499_v22  ;;  %v2639_v42 = vpop.f32.mrb[40].mxu0  ;;  %v2641_v60 = vpop.f32.mrb[40].mxu1 }
 0x138   : > { %v2643_v32 = vpop.f32.mrb[41].mxu0  ;;  %v2645_v34 = vpop.f32.mrb[41].mxu1 }
 0x139   : > { %v951_v55 = vadd.f32 %v950_v54, %v848_v50  ;;  %v731_v0 = vadd.f32 %v730_v2, %v2503_v26  ;;  %v2652_v53 = vpop.f32.mrb[42].mxu0  ;;  %v2654_v41 = vpop.f32.mrb[42].mxu1  ;;  %v851_v54 = vmul.f32 %v2505_v35, %v2505_v35  ;;  %v852_v26 = vmul.f32 %v2510_v39, %v2510_v39 }
 0x13a   : > { %5245 = vst [vmem:[#allocation54_spill] sm:$0xff] %v2654_v41  ;;  %v2656_v48 = vpop.f32.mrb[43].mxu0  ;;  %v2658_v22 = vpop.f32.mrb[43].mxu1 }
 0x13b   : > { %5246 = vst [vmem:[#allocation55_spill] sm:$0xff] %v2656_v48  ;;  %5247 = vst [vmem:[#allocation56_spill] sm:$0xff] %v2658_v22  ;;  %v952_v1 = vadd.f32 %v951_v55, %v849_v18  ;;  %v732_v40 = vadd.f32 %v731_v0, %v2501_v25 }
 0x13d   : > { %v953_v50 = vadd.f32 %v952_v1, %v850_v3  ;;  %v733_v2 = vadd.f32 %v732_v40, %v2505_v35  ;;  %v853_v40 = vmul.f32 %v2514_v45, %v2514_v45  ;;  %v854_v35 = vmul.f32 %v2512_v44, %v2512_v44 }
 0x13f   : > { %v734_v31 = vadd.f32 %v733_v2, %v2510_v39  ;;  %v954_v29 = vadd.f32 %v953_v50, %v851_v54  ;;  %v2667_v30 = vpop.f32.mrb[44].mxu0  ;;  %v2669_v28 = vpop.f32.mrb[44].mxu1 }
 0x140   : > { %5248 = vst [vmem:[#allocation57_spill] sm:$0xff] %v2667_v30  ;;  %5249 = vst [vmem:[#allocation58_spill] sm:$0xff] %v2669_v28  ;;  %v2671_v24 = vpop.f32.mrb[45].mxu0  ;;  %v2673_v55 = vpop.f32.mrb[45].mxu1 }
 0x141   : > { %5250 = vst [vmem:[#allocation59_spill] sm:$0xff] %v2671_v24  ;;  %5251 = vst [vmem:[#allocation60_spill] sm:$0xff] %v2673_v55  ;;  %v735_v1 = vadd.f32 %v734_v31, %v2514_v45  ;;  %v955_v3 = vadd.f32 %v954_v29, %v852_v26  ;;  %v2678_v0 = vpop.f32.mrb[46].mxu0  ;;  %v2680_v18 = vpop.f32.mrb[46].mxu1  ;;  %v855_v29 = vmul.f32 %v2516_v46, %v2516_v46 }
 0x142   : > { %5252 = vst [vmem:[#allocation61_spill] sm:$0xff] %v2678_v0  ;;  %5253 = vst [vmem:[#allocation62_spill] sm:$0xff] %v2680_v18  ;;  %v2682_v2 = vpop.f32.mrb[47].mxu0  ;;  %v2684_v50 = vpop.f32.mrb[47].mxu1  ;;  %v856_v31 = vmul.f32 %v2527_v12, %v2527_v12 }
 0x143   : > { %5254 = vst [vmem:[#allocation63_spill] sm:$0xff] %v2682_v2  ;;  %5255 = vst [vmem:[#allocation64_spill] sm:$0xff] %v2684_v50  ;;  %v956_v54 = vadd.f32 %v955_v3, %v853_v40  ;;  %v736_v39 = vadd.f32 %v735_v1, %v2512_v44 }
 0x145   : > { %v957_v25 = vadd.f32 %v956_v54, %v854_v35  ;;  %v737_v21 = vadd.f32 %v736_v39, %v2516_v46  ;;  %v857_v54 = vmul.f32 %v2531_v14, %v2531_v14  ;;  %v858_v46 = vmul.f32 %v2529_v13, %v2529_v13 }
 0x147   : > { %v958_v26 = vadd.f32 %v957_v25, %v855_v29  ;;  %v738_v45 = vadd.f32 %v737_v21, %v2527_v12  ;;  %v2695_v23 = vpop.f32.mrb[48].mxu0  ;;  %v2697_v40 = vpop.f32.mrb[48].mxu1 }
 0x148   : > { %5256 = vst [vmem:[#allocation65_spill] sm:$0xff] %v2695_v23  ;;  %5257 = vst [vmem:[#allocation66_spill] sm:$0xff] %v2697_v40  ;;  %v2699_v1 = vpop.f32.mrb[49].mxu0  ;;  %v2701_v3 = vpop.f32.mrb[49].mxu1 }
 0x149   : > { %5258 = vst [vmem:[#allocation67_spill] sm:$0xff] %v2699_v1  ;;  %5259 = vst [vmem:[#allocation68_spill] sm:$0xff] %v2701_v3  ;;  %v959_v35 = vadd.f32 %v958_v26, %v856_v31  ;;  %v739_v39 = vadd.f32 %v738_v45, %v2531_v14  ;;  %v2708_v25 = vpop.f32.mrb[50].mxu0  ;;  %v2710_v21 = vpop.f32.mrb[50].mxu1  ;;  %v859_v26 = vmul.f32 %v2533_v15, %v2533_v15 }
 0x14a   : > { %5260 = vst [vmem:[#allocation69_spill] sm:$0xff] %v2708_v25  ;;  %5261 = vst [vmem:[#allocation70_spill] sm:$0xff] %v2710_v21  ;;  %v2712_v29 = vpop.f32.mrb[51].mxu0  ;;  %v2714_v12 = vpop.f32.mrb[51].mxu1  ;;  %v860_v14 = vmul.f32 %v2540_v56, %v2540_v56  ;;  %v861_v21 = vmul.f32 %v2544_v58, %v2544_v58 }
 0x14b   : > { %5262 = vst [vmem:[#allocation71_spill] sm:$0xff] %v2712_v29  ;;  %5263 = vst [vmem:[#allocation72_spill] sm:$0xff] %v2714_v12  ;;  %v960_v44 = vadd.f32 %v959_v35, %v857_v54  ;;  %v740_v20 = vadd.f32 %v739_v39, %v2529_v13 }
 0x14d   : > { %v961_v31 = vadd.f32 %v960_v44, %v858_v46  ;;  %v741_v45 = vadd.f32 %v740_v20, %v2533_v15  ;;  %v862_v20 = vmul.f32 %v2542_v57, %v2542_v57  ;;  %v863_v15 = vmul.f32 %v2546_v59, %v2546_v59 }
 0x14f   : > { %v742_v3 = vadd.f32 %v741_v45, %v2540_v56  ;;  %v962_v25 = vadd.f32 %v961_v31, %v859_v26  ;;  %v864_v31 = vmul.f32 %v2555_v6, %v2555_v6 }
 0x151   : > { %v743_v12 = vadd.f32 %v742_v3, %v2544_v58  ;;  %v963_v35 = vadd.f32 %v962_v25, %v860_v14  ;;  %v866_v25 = vmul.f32 %v2557_v4, %v2557_v4 }
 0x153   : > { %v964_v54 = vadd.f32 %v963_v35, %v861_v21  ;;  %v744_v44 = vadd.f32 %v743_v12, %v2542_v57  ;;  %v865_v12 = vmul.f32 %v2559_v63, %v2559_v63 }
 0x155   : > { %v965_v46 = vadd.f32 %v964_v54, %v862_v20  ;;  %v745_v39 = vadd.f32 %v744_v44, %v2546_v59  ;;  %v868_v20 = vmul.f32 %v2566_v51, %v2566_v51 }
 0x157   : > { %v966_v45 = vadd.f32 %v965_v46, %v863_v15  ;;  %v746_v26 = vadd.f32 %v745_v39, %v2555_v6  ;;  %v867_v15 = vmul.f32 %v2561_v36, %v2561_v36 }
 0x159   : > { %v967_v3 = vadd.f32 %v966_v45, %v864_v31  ;;  %v747_v14 = vadd.f32 %v746_v26, %v2559_v63  ;;  %v869_v31 = vmul.f32 %v2570_v10, %v2570_v10 }
 0x15b   : > { %v968_v21 = vadd.f32 %v967_v3, %v865_v12  ;;  %v748_v35 = vadd.f32 %v747_v14, %v2557_v4  ;;  %v870_v14 = vmul.f32 %v2568_v8, %v2568_v8 }
 0x15d   : > { %v969_v54 = vadd.f32 %v968_v21, %v866_v25  ;;  %v749_v44 = vadd.f32 %v748_v35, %v2561_v36  ;;  %v871_v35 = vmul.f32 %v2572_v9, %v2572_v9 }
 0x15f   : > { %v750_v46 = vadd.f32 %v749_v44, %v2566_v51  ;;  %v970_v39 = vadd.f32 %v969_v54, %v867_v15  ;;  %v872_v54 = vmul.f32 %v2583_v62, %v2583_v62 }
 0x161   : > { %v971_v45 = vadd.f32 %v970_v39, %v868_v20  ;;  %v751_v26 = vadd.f32 %v750_v46, %v2570_v10  ;;  %v873_v39 = vmul.f32 %v2587_v37, %v2587_v37 }
 0x163   : > { %v752_v3 = vadd.f32 %v751_v26, %v2568_v8  ;;  %v972_v12 = vadd.f32 %v971_v45, %v869_v31  ;;  %v874_v31 = vmul.f32 %v2585_v16, %v2585_v16 }
 0x165   : > { %v973_v25 = vadd.f32 %v972_v12, %v870_v14  ;;  %v753_v21 = vadd.f32 %v752_v3, %v2572_v9  ;;  %v875_v12 = vmul.f32 %v2589_v38, %v2589_v38 }
 0x167   : > { %v974_v44 = vadd.f32 %v973_v25, %v871_v35  ;;  %v754_v15 = vadd.f32 %v753_v21, %v2583_v62  ;;  %v876_v25 = vmul.f32 %v2596_v17, %v2596_v17 }
 0x169   : > { %v975_v20 = vadd.f32 %v974_v44, %v872_v54  ;;  %v755_v46 = vadd.f32 %v754_v15, %v2587_v37  ;;  %v877_v54 = vmul.f32 %v2600_v5, %v2600_v5 }
 0x16b   : > { %v976_v45 = vadd.f32 %v975_v20, %v873_v39  ;;  %v756_v26 = vadd.f32 %v755_v46, %v2585_v16  ;;  %v878_v46 = vmul.f32 %v2598_v61, %v2598_v61 }
 0x16d   : > { %v977_v3 = vadd.f32 %v976_v45, %v874_v31  ;;  %v757_v14 = vadd.f32 %v756_v26, %v2589_v38  ;;  %v879_v26 = vmul.f32 %v2602_v52, %v2602_v52 }
 0x16f   : > { %v758_v21 = vadd.f32 %v757_v14, %v2596_v17  ;;  %v978_v35 = vadd.f32 %v977_v3, %v875_v12  ;;  %v880_v3 = vmul.f32 %v2611_v49, %v2611_v49 }
 0x171   : > { %v979_v44 = vadd.f32 %v978_v35, %v876_v25  ;;  %v759_v15 = vadd.f32 %v758_v21, %v2600_v5  ;;  %v881_v35 = vmul.f32 %v2615_v43, %v2615_v43 }
 0x173   : > { %v760_v20 = vadd.f32 %v759_v15, %v2598_v61  ;;  %v980_v39 = vadd.f32 %v979_v44, %v877_v54  ;;  %v882_v54 = vmul.f32 %v2613_v47, %v2613_v47 }
 0x175   : > { %v981_v31 = vadd.f32 %v980_v39, %v878_v46  ;;  %v761_v45 = vadd.f32 %v760_v20, %v2602_v52  ;;  %v883_v39 = vmul.f32 %v2617_v19, %v2617_v19 }
 0x177   : > { %v982_v14 = vadd.f32 %v981_v31, %v879_v26  ;;  %v762_v12 = vadd.f32 %v761_v45, %v2611_v49  ;;  %v884_v31 = vmul.f32 %v2622_v27, %v2622_v27 }
 0x179   : > { %v983_v25 = vadd.f32 %v982_v14, %v880_v3  ;;  %v763_v21 = vadd.f32 %v762_v12, %v2615_v43  ;;  %v885_v3 = vmul.f32 %v2626_v33, %v2626_v33 }
 0x17b   : > { %v984_v44 = vadd.f32 %v983_v25, %v881_v35  ;;  %v764_v15 = vadd.f32 %v763_v21, %v2613_v47  ;;  %v886_v21 = vmul.f32 %v2624_v11, %v2624_v11 }
 0x17d   : > { %v985_v20 = vadd.f32 %v984_v44, %v882_v54  ;;  %v765_v46 = vadd.f32 %v764_v15, %v2617_v19  ;;  %v887_v15 = vmul.f32 %v2628_v7, %v2628_v7 }
 0x17f   : > { %v766_v45 = vadd.f32 %v765_v46, %v2622_v27  ;;  %v986_v26 = vadd.f32 %v985_v20, %v883_v39  ;;  %v888_v20 = vmul.f32 %v2639_v42, %v2639_v42 }
 0x181   : > { %v987_v14 = vadd.f32 %v986_v26, %v884_v31  ;;  %v767_v12 = vadd.f32 %v766_v45, %v2626_v33  ;;  %v889_v26 = vmul.f32 %v2643_v32, %v2643_v32 }
 0x183   : > { %v768_v25 = vadd.f32 %v767_v12, %v2624_v11  ;;  %v988_v35 = vadd.f32 %v987_v14, %v885_v3  ;;  %v890_v3 = vmul.f32 %v2641_v60, %v2641_v60 }
 0x185   : > { %v989_v54 = vadd.f32 %v988_v35, %v886_v21  ;;  %v769_v44 = vadd.f32 %v768_v25, %v2628_v7  ;;  %v891_v35 = vmul.f32 %v2645_v34, %v2645_v34 }
 0x187   : > { %v990_v46 = vadd.f32 %v989_v54, %v887_v15  ;;  %v770_v39 = vadd.f32 %v769_v44, %v2639_v42  ;;  %v892_v54 = vmul.f32 %v2652_v53, %v2652_v53 }
 0x189   : > { %v991_v31 = vadd.f32 %v990_v46, %v888_v20  ;;  %v771_v45 = vadd.f32 %v770_v39, %v2643_v32  ;;  %v893_v20 = vmul.f32 %v2656_v48, %v2656_v48 }
 0x18b   : > { %v992_v14 = vadd.f32 %v991_v31, %v889_v26  ;;  %v772_v12 = vadd.f32 %v771_v45, %v2641_v60  ;;  %v894_v45 = vmul.f32 %v2654_v41, %v2654_v41 }
 0x18d   : > { %v993_v25 = vadd.f32 %v992_v14, %v890_v3  ;;  %v773_v21 = vadd.f32 %v772_v12, %v2645_v34  ;;  %v895_v12 = vmul.f32 %v2658_v22, %v2658_v22 }
 0x18f   : > { %v774_v44 = vadd.f32 %v773_v21, %v2652_v53  ;;  %v994_v15 = vadd.f32 %v993_v25, %v891_v35  ;;  %v896_v25 = vmul.f32 %v2667_v30, %v2667_v30 }
 0x191   : > { %v995_v46 = vadd.f32 %v994_v15, %v892_v54  ;;  %v775_v39 = vadd.f32 %v774_v44, %v2656_v48  ;;  %v897_v15 = vmul.f32 %v2671_v24, %v2671_v24 }
 0x193   : > { %v776_v31 = vadd.f32 %v775_v39, %v2654_v41  ;;  %v996_v26 = vadd.f32 %v995_v46, %v893_v20  ;;  %v898_v20 = vmul.f32 %v2669_v28, %v2669_v28  ;;  %v1248_v41 = vlaneseq }
 0x195   : > { %v997_v3 = vadd.f32 %v996_v26, %v894_v45  ;;  %v777_v14 = vadd.f32 %v776_v31, %v2658_v22  ;;  %v899_v26 = vmul.f32 %v2673_v55, %v2673_v55 }
 0x197   : > { %v998_v21 = vadd.f32 %v997_v3, %v895_v12  ;;  %v778_v35 = vadd.f32 %v777_v14, %v2667_v30  ;;  %v900_v3 = vmul.f32 %v2678_v0, %v2678_v0 }
 0x199   : > { %v999_v54 = vadd.f32 %v998_v21, %v896_v25  ;;  %v779_v44 = vadd.f32 %v778_v35, %v2671_v24  ;;  %v901_v25 = vmul.f32 %v2682_v2, %v2682_v2 }
 0x19b   : > { %v1000_v46 = vadd.f32 %v999_v54, %v897_v15  ;;  %v780_v39 = vadd.f32 %v779_v44, %v2669_v28  ;;  %v902_v44 = vmul.f32 %v2680_v18, %v2680_v18  ;;  %v1249_v28 = vshrl.u32 %v1248_v41, 7 }
 0x19d   : > { %v1001_v31 = vadd.f32 %v1000_v46, %v898_v20  ;;  %v781_v45 = vadd.f32 %v780_v39, %v2673_v55  ;;  %v903_v39 = vmul.f32 %v2684_v50, %v2684_v50  ;;  %v689_v55 = vld [vmem:[%s4977_s2] sm:$0xf] }
 0x19f   : > { %v782_v14 = vadd.f32 %v781_v45, %v2678_v0  ;;  %v1002_v12 = vadd.f32 %v1001_v31, %v899_v26  ;;  %v904_v31 = vmul.f32 %v2695_v23, %v2695_v23  ;;  %v1254_v0 = vsub.s32 1, %v1249_v28 }
 0x1a1   : > { %v1003_v21 = vadd.f32 %v1002_v12, %v900_v3  ;;  %v783_v35 = vadd.f32 %v782_v14, %v2682_v2  ;;  %v905_v12 = vmul.f32 %v2699_v1, %v2699_v1 }
 0x1a3   : > { %v784_v54 = vadd.f32 %v783_v35, %v2680_v18  ;;  %v1004_v15 = vadd.f32 %v1003_v21, %v901_v25  ;;  %v906_v25 = vmul.f32 %v2697_v40, %v2697_v40 }
 0x1a5   : > { %v1005_v20 = vadd.f32 %v1004_v15, %v902_v44  ;;  %v785_v46 = vadd.f32 %v784_v54, %v2684_v50  ;;  %v5264_v54 = vld [vmem:[#allocation69_spill] sm:$0xff] }
 0x1a6   : > { %v908_v44 = vmul.f32 %v5264_v54, %v5264_v54 }
 0x1a7   : > { %v1006_v45 = vadd.f32 %v1005_v20, %v903_v39  ;;  %v786_v26 = vadd.f32 %v785_v46, %v2695_v23  ;;  %v5265_v20 = vld [vmem:[#allocation68_spill] sm:$0xff] }
 0x1a8   : > { %v907_v46 = vmul.f32 %v5265_v20, %v5265_v20 }
 0x1a9   : > { %v1007_v3 = vadd.f32 %v1006_v45, %v904_v31  ;;  %v787_v14 = vadd.f32 %v786_v26, %v2699_v1  ;;  %v791_v31 = vsel %vm790_vm2, %v5264_v54, 0.0  ;;  %v909_v45 = vmul.f32 %v2712_v29, %v2712_v29  ;;  %v5267_v1 = vld [vmem:[#allocation72_spill] sm:$0xff] }
 0x1aa   : > { %v911_v54 = vmul.f32 %v5267_v1, %v5267_v1 }
 0x1ab   : > { %v1008_v21 = vadd.f32 %v1007_v3, %v905_v12  ;;  %v788_v35 = vadd.f32 %v787_v14, %v2697_v40  ;;  %v1011_v12 = vsel %vm790_vm2, %v908_v44, 0.0  ;;  %v793_v14 = vsel %vm790_vm2, %v2712_v29, 0.0  ;;  %v5266_v40 = vld [vmem:[#allocation70_spill] sm:$0xff] }
 0x1ac   : > { %v795_v23 = vsel %vm790_vm2, %v5266_v40, 0.0  ;;  %v797_v44 = vsel %vm790_vm2, %v5267_v1, 0.0 }
 0x1ad   : > { %v1009_v15 = vadd.f32 %v1008_v21, %v906_v25  ;;  %v789_v39 = vadd.f32 %v788_v35, %v5265_v20  ;;  %v910_v25 = vmul.f32 %v5266_v40, %v5266_v40  ;;  %v1013_v20 = vsel %vm790_vm2, %v909_v45, 0.0 }
 0x1af   : > { %v792_v26 = vadd.f32 %v791_v31, %v789_v39  ;;  %v1010_v3 = vadd.f32 %v1009_v15, %v907_v46  ;;  %v1015_v46 = vsel %vm790_vm2, %v910_v25, 0.0 }
 0x1b1   : > { %v794_v21 = vadd.f32 %v793_v14, %v792_v26  ;;  %v1012_v35 = vadd.f32 %v1011_v12, %v1010_v3  ;;  %v1017_v26 = vsel %vm790_vm2, %v911_v54, 0.0  ;;  %v5268_v54 = vld [vmem:[#allocation2_spill] sm:$0xff] }
 0x1b3   : > { %v796_v39 = vadd.f32 %v795_v23, %v794_v21  ;;  %v1014_v15 = vadd.f32 %v1013_v20, %v1012_v35 }
 0x1b5   : > { %v798_v31 = vadd.f32 %v797_v44, %v796_v39  ;;  %v1016_v29 = vadd.f32 %v1015_v46, %v1014_v15  ;;  %v5302_v15 = vld [vmem:[#allocation35_spill] sm:$0xff] }
 0x1b7   : > { %799 = vadd.xlane.f32.xlu0 %v798_v31  ;;  %v1018_v3 = vadd.f32 %v1017_v26, %v1016_v29  ;;  %v5273_v26 = vld [vmem:[#allocation8_spill] sm:$0xff]  ;;  %v1258_v31 = vsub.s32 2, %v1249_v28 }
 0x1b9   : > { %v3104_v46 = vrot.slane %v689_v55, %v1258_v31 }
 0x1bb   : > { %1019 = vadd.xlane.f32.xlu0 %v1018_v3  ;;  %v3102_v3 = vrot.slane %v689_v55, %v1254_v0 }
 0x244   : > { %v800_v45 = vpop.xlane.xlu0 %799 }
 0x245   : > { %v801_v12 = vrot.slane %v800_v45, 4 }
 0x247   : > { %v802_v14 = vadd.f32 %v801_v12, %v800_v45  ;;  %v5315_v12 = vld [vmem:[#allocation49_spill] sm:$0xff] }
 0x248   : > { %v1020_v50 = vpop.xlane.xlu0 %1019 }
 0x249   : > { %v803_v18 = vrot.slane %v802_v14, 2  ;;  %v1021_v40 = vrot.slane %v1020_v50, 4 }
 0x24b   : > { %v1022_v23 = vadd.f32 %v1021_v40, %v1020_v50  ;;  %v804_v20 = vadd.f32 %v803_v18, %v802_v14  ;;  %v5269_v50 = vld [vmem:[#allocation4_spill] sm:$0xff]  ;;  %v5270_v40 = vld [vmem:[#allocation3_spill] sm:$0xff]  ;;  %v5316_v14 = vld [vmem:[#allocation50_spill] sm:$0xff] }
 0x24c   : > { %v5314_v18 = vld [vmem:[#allocation47_spill] sm:$0xff] }
 0x24d   : > { %v1023_v21 = vrot.slane %v1022_v23, 2  ;;  %v805_v35 = vrot.slane %v804_v20, 1 }
 0x24f   : > { %v1024_v1 = vadd.f32 %v1023_v21, %v1022_v23  ;;  %v806_v2 = vadd.f32 %v805_v35, %v804_v20  ;;  %v5313_v20 = vld [vmem:[#allocation48_spill] sm:$0xff]  ;;  %v5317_v23 = vld [vmem:[#allocation51_spill] sm:$0xff]  ;;  %v690_v35 = vld [vmem:[%s4978_s3] sm:$0xf] }
 0x250   : > { %v3112_v22 = vrot.slane %v690_v35, %v1254_v0 }
 0x251   : > { %2191 = vpush %v806_v2  ;;  %v1025_v25 = vrot.slane %v1024_v1, 1  ;;  %v5271_v2 = vld [vmem:[#allocation5_spill] sm:$0xff] }
 0x252   : > { %5332 = vst [vmem:[#allocation3_spill] sm:$0xff] %v3112_v22 }
 0x253   : > { %v1026_v39 = vadd.f32 %v1025_v25, %v1024_v1  ;;  %v5272_v1 = vld [vmem:[#allocation6_spill] sm:$0xff]  ;;  %v5311_v25 = vld [vmem:[#allocation45_spill] sm:$0xff] }
 0x255   : > { %2193 = vpush %v1026_v39  ;;  %v5318_v39 = vld [vmem:[#allocation52_spill] sm:$0xff] }
 0x282   : > { %s2192_s29 = spop %2191 }
 0x283   : > { %s1028_s30 = smul.f32 9.621305e-06, %s2192_s29 }
 0x285   : > { %v2884_v29 = vstv %s1028_s30  ;;  %s1030_s5 = smul.f32 %s1028_s30, %s1028_s30 }
 0x286   : > { %s2194_s6 = spop %2193  ;;  %v5337_v0 = vsub.f32 %v5270_v40, %v2884_v29 }
 0x287   : > { %s1029_s7 = smul.f32 9.621305e-06, %s2194_s6 }
 0x289   : > { %s1031_s8 = ssub.f32 %s1029_s7, %s1030_s5 }
 0x28b   : > { %s1032_s10 = smax.f32 %s2237_s9, %s1031_s8 }
 0x28c   : > { %s1033_s11 = sadd.f32 1e-05, %s1032_s10 }
 0x28e   : > { %v1034_v45 = vstv %s1033_s11 }
 0x28f   : > { %2226 = vrsqrt.f32 %v1034_v45  ;;  %v1250_v45 = vsub.s32 0, %v1249_v28 }
 0x291   : > { %v3100_v44 = vrot.slane %v689_v55, %v1250_v45  ;;  %v3108_v24 = vrot.slane %v690_v35, %v1250_v45 }
 0x293   : > { %5330 = vst [vmem:[#allocation2_spill] sm:$0xff] %v3100_v44  ;;  %5331 = vst [vmem:[#allocation4_spill] sm:$0xff] %v3108_v24  ;;  %v5335_v44 = vsub.f32 %v5268_v54, %v2884_v29 }
 0x299   : > { %v2227_v16 = vpop.eup %2226 }
 0x29a   : > { %2195 = vpush %v2227_v16  ;;  %v1262_v16 = vsub.s32 3, %v1249_v28  ;;  %v3114_v28 = vrot.slane %v690_v35, %v1258_v31 }
 0x29c   : > { %v3106_v41 = vrot.slane %v689_v55, %v1262_v16  ;;  %5333 = vst [vmem:[#allocation5_spill] sm:$0xff] %v3114_v28  ;;  %v3116_v21 = vrot.slane %v690_v35, %v1262_v16  ;;  %v5336_v55 = vsub.f32 %v5269_v50, %v2884_v29  ;;  %v5338_v35 = vsub.f32 %v5271_v2, %v2884_v29 }
 0x29d   : > { %v5340_v16 = vsub.f32 %v5273_v26, %v2884_v29 }
 0x29e   : > { %5334 = vst [vmem:[#allocation6_spill] sm:$0xff] %v3116_v21 }
 0x2cb   : > { %s2196_s18 = spop %2195 }
 0x2cc   : > { %v3110_v30 = vstv %s2196_s18 }
 0x2cd   : > { %v3122_v48 = vmul.f32 %v3110_v30, %v5335_v44  ;;  %v3128_v45 = vmul.f32 %v3110_v30, %v5336_v55  ;;  %v3134_v31 = vmul.f32 %v3110_v30, %v5337_v0  ;;  %v3140_v54 = vmul.f32 %v3110_v30, %v5338_v35  ;;  %v5341_v55 = vld [vmem:[#allocation7_spill] sm:$0xff]  ;;  %v5343_v35 = vld [vmem:[#allocation9_spill] sm:$0xff] }
 0x2ce   : > { %v5339_v44 = vsub.f32 %v5272_v1, %v2884_v29  ;;  %v3152_v40 = vmul.f32 %v3110_v30, %v5340_v16  ;;  %v5342_v0 = vsub.f32 %v5341_v55, %v2884_v29  ;;  %v5344_v21 = vsub.f32 %v5343_v35, %v2884_v29  ;;  %v5349_v16 = vld [vmem:[#allocation12_spill] sm:$0xff] }
 0x2cf   : > { %v5350_v22 = vsub.f32 %v5349_v16, %v2884_v29 }
 0x2d0   : > { %v3146_v50 = vmul.f32 %v3110_v30, %v5339_v44  ;;  %v3158_v2 = vmul.f32 %v3110_v30, %v5342_v0  ;;  %v3164_v1 = vmul.f32 %v3110_v30, %v5344_v21  ;;  %v5346_v44 = vld [vmem:[#allocation10_spill] sm:$0xff]  ;;  %v5352_v0 = vld [vmem:[#allocation11_spill] sm:$0xff]  ;;  %v5355_v21 = vld [vmem:[#allocation13_spill] sm:$0xff] }
 0x2d1   : > { %v5347_v28 = vsub.f32 %v5346_v44, %v2884_v29  ;;  %v3176_v55 = vmul.f32 %v3110_v30, %v5350_v22  ;;  %v5353_v24 = vsub.f32 %v5352_v0, %v2884_v29  ;;  %v5361_v22 = vld [vmem:[#allocation16_spill] sm:$0xff] }
 0x2d2   : > { %5345 = vst [vmem:[#allocation8_spill] sm:$0xff] %v3164_v1  ;;  %v5356_v1 = vsub.f32 %v5355_v21, %v2884_v29 }
 0x2d3   : > { %v3170_v26 = vmul.f32 %v3110_v30, %v5347_v28  ;;  %5351 = vst [vmem:[#allocation45_spill] sm:$0xff] %v3176_v55  ;;  %v3182_v35 = vmul.f32 %v3110_v30, %v5353_v24  ;;  %v5358_v28 = vld [vmem:[#allocation14_spill] sm:$0xff]  ;;  %v5362_v55 = vsub.f32 %v5361_v22, %v2884_v29  ;;  %v5364_v24 = vld [vmem:[#allocation15_spill] sm:$0xff] }
 0x2d4   : > { %v3188_v44 = vmul.f32 %v3110_v30, %v5356_v1  ;;  %v5367_v1 = vld [vmem:[#allocation17_spill] sm:$0xff] }
 0x2d5   : > { %5348 = vst [vmem:[#allocation35_spill] sm:$0xff] %v3170_v26  ;;  %5354 = vst [vmem:[#allocation48_spill] sm:$0xff] %v3182_v35  ;;  %v5359_v26 = vsub.f32 %v5358_v28, %v2884_v29  ;;  %v3200_v0 = vmul.f32 %v3110_v30, %v5362_v55  ;;  %v5365_v35 = vsub.f32 %v5364_v24, %v2884_v29  ;;  %v5373_v55 = vld [vmem:[#allocation20_spill] sm:$0xff] }
 0x2d6   : > { %5357 = vst [vmem:[#allocation47_spill] sm:$0xff] %v3188_v44  ;;  %v5368_v44 = vsub.f32 %v5367_v1, %v2884_v29 }
 0x2d7   : > { %v3194_v16 = vmul.f32 %v3110_v30, %v5359_v26  ;;  %5363 = vst [vmem:[#allocation50_spill] sm:$0xff] %v3200_v0  ;;  %v3206_v21 = vmul.f32 %v3110_v30, %v5365_v35  ;;  %v5370_v26 = vld [vmem:[#allocation18_spill] sm:$0xff]  ;;  %v5374_v0 = vsub.f32 %v5373_v55, %v2884_v29  ;;  %v5376_v35 = vld [vmem:[#allocation19_spill] sm:$0xff] }
 0x2d8   : > { %v3212_v28 = vmul.f32 %v3110_v30, %v5368_v44  ;;  %v5379_v44 = vld [vmem:[#allocation21_spill] sm:$0xff] }
 0x2d9   : > { %5360 = vst [vmem:[#allocation49_spill] sm:$0xff] %v3194_v16  ;;  %5366 = vst [vmem:[#allocation51_spill] sm:$0xff] %v3206_v21  ;;  %v5371_v16 = vsub.f32 %v5370_v26, %v2884_v29  ;;  %v3224_v24 = vmul.f32 %v3110_v30, %v5374_v0  ;;  %v5377_v21 = vsub.f32 %v5376_v35, %v2884_v29  ;;  %v5385_v0 = vld [vmem:[#allocation24_spill] sm:$0xff] }
 0x2da   : > { %5369 = vst [vmem:[#allocation52_spill] sm:$0xff] %v3212_v28  ;;  %v5380_v28 = vsub.f32 %v5379_v44, %v2884_v29 }
 0x2db   : > { %v3218_v22 = vmul.f32 %v3110_v30, %v5371_v16  ;;  %5375 = vst [vmem:[#allocation9_spill] sm:$0xff] %v3224_v24  ;;  %v3230_v1 = vmul.f32 %v3110_v30, %v5377_v21  ;;  %v5382_v16 = vld [vmem:[#allocation22_spill] sm:$0xff]  ;;  %v5386_v24 = vsub.f32 %v5385_v0, %v2884_v29  ;;  %v5388_v21 = vld [vmem:[#allocation23_spill] sm:$0xff] }
 0x2dc   : > { %v3236_v26 = vmul.f32 %v3110_v30, %v5380_v28  ;;  %v5391_v28 = vld [vmem:[#allocation25_spill] sm:$0xff] }
 0x2dd   : > { %5372 = vst [vmem:[#allocation7_spill] sm:$0xff] %v3218_v22  ;;  %5378 = vst [vmem:[#allocation10_spill] sm:$0xff] %v3230_v1  ;;  %v5383_v22 = vsub.f32 %v5382_v16, %v2884_v29  ;;  %v3248_v35 = vmul.f32 %v3110_v30, %v5386_v24  ;;  %v5389_v1 = vsub.f32 %v5388_v21, %v2884_v29  ;;  %v5397_v24 = vld [vmem:[#allocation28_spill] sm:$0xff] }
 0x2de   : > { %5381 = vst [vmem:[#allocation12_spill] sm:$0xff] %v3236_v26  ;;  %v5392_v26 = vsub.f32 %v5391_v28, %v2884_v29 }
 0x2df   : > { %v3242_v55 = vmul.f32 %v3110_v30, %v5383_v22  ;;  %5387 = vst [vmem:[#allocation13_spill] sm:$0xff] %v3248_v35  ;;  %v3254_v44 = vmul.f32 %v3110_v30, %v5389_v1  ;;  %v5394_v22 = vld [vmem:[#allocation26_spill] sm:$0xff]  ;;  %v5398_v35 = vsub.f32 %v5397_v24, %v2884_v29  ;;  %v5400_v1 = vld [vmem:[#allocation27_spill] sm:$0xff] }
 0x2e0   : > { %v3260_v16 = vmul.f32 %v3110_v30, %v5392_v26  ;;  %v5403_v26 = vld [vmem:[#allocation29_spill] sm:$0xff] }
 0x2e1   : > { %5384 = vst [vmem:[#allocation11_spill] sm:$0xff] %v3242_v55  ;;  %5390 = vst [vmem:[#allocation14_spill] sm:$0xff] %v3254_v44  ;;  %v5395_v55 = vsub.f32 %v5394_v22, %v2884_v29  ;;  %v3272_v21 = vmul.f32 %v3110_v30, %v5398_v35  ;;  %v5401_v44 = vsub.f32 %v5400_v1, %v2884_v29  ;;  %v5409_v35 = vld [vmem:[#allocation32_spill] sm:$0xff] }
 0x2e2   : > { %5393 = vst [vmem:[#allocation16_spill] sm:$0xff] %v3260_v16  ;;  %v5404_v16 = vsub.f32 %v5403_v26, %v2884_v29 }
 0x2e3   : > { %v3266_v0 = vmul.f32 %v3110_v30, %v5395_v55  ;;  %5399 = vst [vmem:[#allocation17_spill] sm:$0xff] %v3272_v21  ;;  %v3278_v28 = vmul.f32 %v3110_v30, %v5401_v44  ;;  %v5406_v55 = vld [vmem:[#allocation30_spill] sm:$0xff]  ;;  %v5410_v21 = vsub.f32 %v5409_v35, %v2884_v29  ;;  %v5412_v44 = vld [vmem:[#allocation31_spill] sm:$0xff] }
 0x2e4   : > { %v3284_v22 = vmul.f32 %v3110_v30, %v5404_v16  ;;  %v5414_v16 = vld [vmem:[#allocation33_spill] sm:$0xff] }
 0x2e5   : > { %5396 = vst [vmem:[#allocation15_spill] sm:$0xff] %v3266_v0  ;;  %5402 = vst [vmem:[#allocation18_spill] sm:$0xff] %v3278_v28  ;;  %v5407_v0 = vsub.f32 %v5406_v55, %v2884_v29  ;;  %v3296_v1 = vmul.f32 %v3110_v30, %v5410_v21  ;;  %v5413_v28 = vsub.f32 %v5412_v44, %v2884_v29  ;;  %v5420_v21 = vld [vmem:[#allocation36_spill] sm:$0xff] }
 0x2e6   : > { %5405 = vst [vmem:[#allocation20_spill] sm:$0xff] %v3284_v22  ;;  %v5415_v22 = vsub.f32 %v5414_v16, %v2884_v29 }
 0x2e7   : > { %v3290_v24 = vmul.f32 %v3110_v30, %v5407_v0  ;;  %5411 = vst [vmem:[#allocation21_spill] sm:$0xff] %v3296_v1  ;;  %v3302_v26 = vmul.f32 %v3110_v30, %v5413_v28  ;;  %v5417_v0 = vld [vmem:[#allocation34_spill] sm:$0xff]  ;;  %v5421_v1 = vsub.f32 %v5420_v21, %v2884_v29  ;;  %v5423_v28 = vsub.f32 %v5302_v15, %v2884_v29 }
 0x2e8   : > { %v3308_v55 = vmul.f32 %v3110_v30, %v5415_v22  ;;  %v5425_v22 = vld [vmem:[#allocation37_spill] sm:$0xff] }
 0x2e9   : > { %5408 = vst [vmem:[#allocation19_spill] sm:$0xff] %v3290_v24  ;;  %v5418_v24 = vsub.f32 %v5417_v0, %v2884_v29  ;;  %v3320_v44 = vmul.f32 %v3110_v30, %v5421_v1  ;;  %v3326_v16 = vmul.f32 %v3110_v30, %v5423_v28  ;;  %v5431_v1 = vld [vmem:[#allocation40_spill] sm:$0xff]  ;;  %v5434_v28 = vld [vmem:[#allocation39_spill] sm:$0xff] }
 0x2ea   : > { %5416 = vst [vmem:[#allocation22_spill] sm:$0xff] %v3308_v55  ;;  %v5426_v55 = vsub.f32 %v5425_v22, %v2884_v29 }
 0x2eb   : > { %v3314_v35 = vmul.f32 %v3110_v30, %v5418_v24  ;;  %5422 = vst [vmem:[#allocation23_spill] sm:$0xff] %v3320_v44  ;;  %5424 = vst [vmem:[#allocation25_spill] sm:$0xff] %v3326_v16  ;;  %v5428_v24 = vld [vmem:[#allocation38_spill] sm:$0xff]  ;;  %v5432_v44 = vsub.f32 %v5431_v1, %v2884_v29  ;;  %v5435_v16 = vsub.f32 %v5434_v28, %v2884_v29 }
 0x2ec   : > { %v3332_v0 = vmul.f32 %v3110_v30, %v5426_v55  ;;  %v5437_v55 = vld [vmem:[#allocation41_spill] sm:$0xff] }
 0x2ed   : > { %5419 = vst [vmem:[#allocation24_spill] sm:$0xff] %v3314_v35  ;;  %v5429_v35 = vsub.f32 %v5428_v24, %v2884_v29  ;;  %v3344_v15 = vmul.f32 %v3110_v30, %v5432_v44  ;;  %v3350_v22 = vmul.f32 %v3110_v30, %v5435_v16  ;;  %v5442_v44 = vld [vmem:[#allocation44_spill] sm:$0xff]  ;;  %v5444_v16 = vld [vmem:[#allocation43_spill] sm:$0xff] }
 0x2ee   : > { %5427 = vst [vmem:[#allocation26_spill] sm:$0xff] %v3332_v0  ;;  %v5438_v0 = vsub.f32 %v5437_v55, %v2884_v29 }
 0x2ef   : > { %v3338_v21 = vmul.f32 %v3110_v30, %v5429_v35  ;;  %5433 = vst [vmem:[#allocation27_spill] sm:$0xff] %v3344_v15  ;;  %5436 = vst [vmem:[#allocation29_spill] sm:$0xff] %v3350_v22  ;;  %v5439_v35 = vld [vmem:[#allocation42_spill] sm:$0xff]  ;;  %v5443_v15 = vsub.f32 %v5442_v44, %v2884_v29  ;;  %v5445_v22 = vsub.f32 %v5444_v16, %v2884_v29 }
 0x2f0   : > { %v3356_v24 = vmul.f32 %v3110_v30, %v5438_v0  ;;  %v5446_v0 = vsub.f32 %v5311_v25, %v2884_v29 }
 0x2f1   : > { %5430 = vst [vmem:[#allocation28_spill] sm:$0xff] %v3338_v21  ;;  %v5440_v21 = vsub.f32 %v5439_v35, %v2884_v29  ;;  %v3368_v28 = vmul.f32 %v3110_v30, %v5443_v15  ;;  %v3374_v55 = vmul.f32 %v3110_v30, %v5445_v22  ;;  %v5449_v15 = vsub.f32 %v5313_v20, %v2884_v29 }
 0x2f2   : > { %v3380_v35 = vmul.f32 %v3110_v30, %v5446_v0  ;;  %v5450_v22 = vsub.f32 %v5314_v18, %v2884_v29  ;;  %v5451_v0 = vsub.f32 %v5315_v12, %v2884_v29 }
 0x2f3   : > { %v3362_v1 = vmul.f32 %v3110_v30, %v5440_v21  ;;  %v5447_v21 = vld [vmem:[#allocation46_spill] sm:$0xff]  ;;  %v3392_v16 = vmul.f32 %v3110_v30, %v5449_v15  ;;  %v5453_v15 = vsub.f32 %v5317_v23, %v2884_v29 }
 0x2f4   : > { %v3398_v25 = vmul.f32 %v3110_v30, %v5450_v22  ;;  %v5454_v22 = vsub.f32 %v2529_v13, %v2884_v29 }
 0x2f5   : > { %5441 = vst [vmem:[#allocation30_spill] sm:$0xff] %v3362_v1  ;;  %v5448_v1 = vsub.f32 %v5447_v21, %v2884_v29  ;;  %v3404_v21 = vmul.f32 %v3110_v30, %v5451_v0  ;;  %v3416_v18 = vmul.f32 %v3110_v30, %v5453_v15  ;;  %v5455_v0 = vsub.f32 %v5318_v39, %v2884_v29 }
 0x2f6   : > { %v3422_v12 = vmul.f32 %v3110_v30, %v5454_v22  ;;  %v5457_v15 = vsub.f32 %v2544_v58, %v2884_v29  ;;  %v5458_v22 = vsub.f32 %v2542_v57, %v2884_v29 }
 0x2f7   : > { %v3386_v44 = vmul.f32 %v3110_v30, %v5448_v1  ;;  %v5452_v1 = vsub.f32 %v5316_v14, %v2884_v29  ;;  %v3428_v14 = vmul.f32 %v3110_v30, %v5455_v0  ;;  %v5459_v0 = vsub.f32 %v2546_v59, %v2884_v29 }
 0x2f8   : > { %v3440_v13 = vmul.f32 %v3110_v30, %v5457_v15  ;;  %v3446_v39 = vmul.f32 %v3110_v30, %v5458_v22  ;;  %v5461_v15 = vsub.f32 %v2559_v63, %v2884_v29  ;;  %v5462_v22 = vsub.f32 %v2557_v4, %v2884_v29 }
 0x2f9   : > { %v3410_v20 = vmul.f32 %v3110_v30, %v5452_v1  ;;  %v5456_v1 = vsub.f32 %v2540_v56, %v2884_v29  ;;  %v3452_v56 = vmul.f32 %v3110_v30, %v5459_v0  ;;  %v5463_v0 = vsub.f32 %v2561_v36, %v2884_v29 }
 0x2fa   : > { %v3464_v57 = vmul.f32 %v3110_v30, %v5461_v15  ;;  %v3470_v59 = vmul.f32 %v3110_v30, %v5462_v22  ;;  %v5465_v15 = vsub.f32 %v2570_v10, %v2884_v29  ;;  %v5466_v22 = vsub.f32 %v2568_v8, %v2884_v29 }
 0x2fb   : > { %v3434_v23 = vmul.f32 %v3110_v30, %v5456_v1  ;;  %v5460_v1 = vsub.f32 %v2555_v6, %v2884_v29  ;;  %v3476_v6 = vmul.f32 %v3110_v30, %v5463_v0  ;;  %v5468_v0 = vsub.f32 %v2572_v9, %v2884_v29 }
 0x2fc   : > { %v3488_v4 = vmul.f32 %v3110_v30, %v5465_v15  ;;  %v3494_v36 = vmul.f32 %v3110_v30, %v5466_v22  ;;  %v5470_v15 = vsub.f32 %v2587_v37, %v2884_v29  ;;  %v5471_v22 = vld [vmem:[#allocation53_spill] sm:$0xff] }
 0x2fd   : > { %v3458_v58 = vmul.f32 %v3110_v30, %v5460_v1  ;;  %v5464_v1 = vsub.f32 %v2566_v51, %v2884_v29  ;;  %v3500_v51 = vmul.f32 %v3110_v30, %v5468_v0  ;;  %v5473_v0 = vsub.f32 %v2589_v38, %v2884_v29 }
 0x2fe   : > { %5467 = vst [vmem:[#allocation32_spill] sm:$0xff] %v3494_v36  ;;  %v3512_v8 = vmul.f32 %v3110_v30, %v5470_v15  ;;  %v5472_v36 = vsub.f32 %v5471_v22, %v2884_v29  ;;  %v5475_v15 = vsub.f32 %v2600_v5, %v2884_v29 }
 0x2ff   : > { %v3482_v63 = vmul.f32 %v3110_v30, %v5464_v1  ;;  %v5469_v1 = vsub.f32 %v2583_v62, %v2884_v29  ;;  %v3524_v62 = vmul.f32 %v3110_v30, %v5473_v0  ;;  %v5477_v0 = vsub.f32 %v2602_v52, %v2884_v29 }
 0x300   : > { %v3518_v9 = vmul.f32 %v3110_v30, %v5472_v36  ;;  %v3536_v22 = vmul.f32 %v3110_v30, %v5475_v15  ;;  %v5476_v36 = vsub.f32 %v2598_v61, %v2884_v29  ;;  %v5479_v15 = vsub.f32 %v2615_v43, %v2884_v29 }
 0x301   : > { %v3506_v10 = vmul.f32 %v3110_v30, %v5469_v1  ;;  %v5474_v1 = vsub.f32 %v2596_v17, %v2884_v29  ;;  %v3548_v17 = vmul.f32 %v3110_v30, %v5477_v0  ;;  %v5481_v0 = vsub.f32 %v2617_v19, %v2884_v29 }
 0x302   : > { %v3542_v38 = vmul.f32 %v3110_v30, %v5476_v36  ;;  %v3560_v61 = vmul.f32 %v3110_v30, %v5479_v15  ;;  %v5480_v36 = vsub.f32 %v2613_v47, %v2884_v29  ;;  %v5483_v15 = vsub.f32 %v2626_v33, %v2884_v29 }
 0x303   : > { %v3530_v37 = vmul.f32 %v3110_v30, %v5474_v1  ;;  %v5478_v1 = vsub.f32 %v2611_v49, %v2884_v29  ;;  %v3572_v49 = vmul.f32 %v3110_v30, %v5481_v0  ;;  %v5485_v0 = vsub.f32 %v2628_v7, %v2884_v29 }
 0x304   : > { %v3566_v52 = vmul.f32 %v3110_v30, %v5480_v36  ;;  %v3584_v47 = vmul.f32 %v3110_v30, %v5483_v15  ;;  %v5484_v36 = vsub.f32 %v2624_v11, %v2884_v29  ;;  %v5487_v15 = vsub.f32 %v2643_v32, %v2884_v29 }
 0x305   : > { %v3554_v5 = vmul.f32 %v3110_v30, %v5478_v1  ;;  %v5482_v1 = vsub.f32 %v2622_v27, %v2884_v29  ;;  %v3596_v27 = vmul.f32 %v3110_v30, %v5485_v0  ;;  %v5491_v0 = vsub.f32 %v2645_v34, %v2884_v29 }
 0x306   : > { %v3590_v19 = vmul.f32 %v3110_v30, %v5484_v36  ;;  %v3608_v11 = vmul.f32 %v3110_v30, %v5487_v15  ;;  %v5489_v36 = vsub.f32 %v2641_v60, %v2884_v29  ;;  %v5495_v15 = vld [vmem:[#allocation55_spill] sm:$0xff] }
 0x307   : > { %v3578_v43 = vmul.f32 %v3110_v30, %v5482_v1  ;;  %v5486_v1 = vsub.f32 %v2639_v42, %v2884_v29  ;;  %v3620_v42 = vmul.f32 %v3110_v30, %v5491_v0  ;;  %v5501_v0 = vld [vmem:[#allocation56_spill] sm:$0xff] }
 0x308   : > { %5488 = vst [vmem:[#allocation31_spill] sm:$0xff] %v3608_v11  ;;  %v3614_v7 = vmul.f32 %v3110_v30, %v5489_v36  ;;  %v5496_v11 = vsub.f32 %v5495_v15, %v2884_v29  ;;  %v5498_v36 = vld [vmem:[#allocation54_spill] sm:$0xff] }
 0x309   : > { %v3602_v33 = vmul.f32 %v3110_v30, %v5486_v1  ;;  %5492 = vst [vmem:[#allocation34_spill] sm:$0xff] %v3620_v42  ;;  %v5493_v1 = vsub.f32 %v2652_v53, %v2884_v29  ;;  %v5502_v42 = vsub.f32 %v5501_v0, %v2884_v29 }
 0x30a   : > { %5490 = vst [vmem:[#allocation33_spill] sm:$0xff] %v3614_v7  ;;  %v3632_v60 = vmul.f32 %v3110_v30, %v5496_v11  ;;  %v5499_v7 = vsub.f32 %v5498_v36, %v2884_v29  ;;  %v5507_v11 = vld [vmem:[#allocation59_spill] sm:$0xff] }
 0x30b   : > { %v3626_v32 = vmul.f32 %v3110_v30, %v5493_v1  ;;  %v3644_v53 = vmul.f32 %v3110_v30, %v5502_v42  ;;  %v5504_v1 = vld [vmem:[#allocation57_spill] sm:$0xff]  ;;  %v5513_v42 = vld [vmem:[#allocation60_spill] sm:$0xff] }
 0x30c   : > { %5497 = vst [vmem:[#allocation37_spill] sm:$0xff] %v3632_v60  ;;  %v3638_v34 = vmul.f32 %v3110_v30, %v5499_v7  ;;  %v5508_v60 = vsub.f32 %v5507_v11, %v2884_v29  ;;  %v5510_v7 = vld [vmem:[#allocation58_spill] sm:$0xff] }
 0x30d   : > { %5494 = vst [vmem:[#allocation36_spill] sm:$0xff] %v3626_v32  ;;  %5503 = vst [vmem:[#allocation40_spill] sm:$0xff] %v3644_v53  ;;  %v5505_v32 = vsub.f32 %v5504_v1, %v2884_v29  ;;  %v5514_v53 = vsub.f32 %v5513_v42, %v2884_v29 }
 0x30e   : > { %5500 = vst [vmem:[#allocation38_spill] sm:$0xff] %v3638_v34  ;;  %v3656_v36 = vmul.f32 %v3110_v30, %v5508_v60  ;;  %v5511_v34 = vsub.f32 %v5510_v7, %v2884_v29  ;;  %v5519_v60 = vld [vmem:[#allocation63_spill] sm:$0xff] }
 0x30f   : > { %v3650_v15 = vmul.f32 %v3110_v30, %v5505_v32  ;;  %v3668_v1 = vmul.f32 %v3110_v30, %v5514_v53  ;;  %v5516_v32 = vld [vmem:[#allocation61_spill] sm:$0xff]  ;;  %v5525_v53 = vld [vmem:[#allocation64_spill] sm:$0xff] }
 0x310   : > { %5509 = vst [vmem:[#allocation41_spill] sm:$0xff] %v3656_v36  ;;  %v3662_v0 = vmul.f32 %v3110_v30, %v5511_v34  ;;  %v5520_v36 = vsub.f32 %v5519_v60, %v2884_v29  ;;  %v5522_v34 = vld [vmem:[#allocation62_spill] sm:$0xff] }
 0x311   : > { %5506 = vst [vmem:[#allocation39_spill] sm:$0xff] %v3650_v15  ;;  %5515 = vst [vmem:[#allocation44_spill] sm:$0xff] %v3668_v1  ;;  %v5517_v15 = vsub.f32 %v5516_v32, %v2884_v29  ;;  %v5526_v1 = vsub.f32 %v5525_v53, %v2884_v29 }
 0x312   : > { %5512 = vst [vmem:[#allocation42_spill] sm:$0xff] %v3662_v0  ;;  %v3680_v7 = vmul.f32 %v3110_v30, %v5520_v36  ;;  %v5523_v0 = vsub.f32 %v5522_v34, %v2884_v29  ;;  %v5531_v36 = vld [vmem:[#allocation67_spill] sm:$0xff] }
 0x313   : > { %v3674_v11 = vmul.f32 %v3110_v30, %v5517_v15  ;;  %v3692_v32 = vmul.f32 %v3110_v30, %v5526_v1  ;;  %v5528_v15 = vld [vmem:[#allocation65_spill] sm:$0xff]  ;;  %v5537_v1 = vld [vmem:[#allocation68_spill] sm:$0xff] }
 0x314   : > { %5521 = vst [vmem:[#allocation46_spill] sm:$0xff] %v3680_v7  ;;  %v3686_v42 = vmul.f32 %v3110_v30, %v5523_v0  ;;  %v5532_v7 = vsub.f32 %v5531_v36, %v2884_v29  ;;  %v5534_v0 = vld [vmem:[#allocation66_spill] sm:$0xff] }
 0x315   : > { %5518 = vst [vmem:[#allocation43_spill] sm:$0xff] %v3674_v11  ;;  %5527 = vst [vmem:[#allocation55_spill] sm:$0xff] %v3692_v32  ;;  %v5529_v11 = vsub.f32 %v5528_v15, %v2884_v29  ;;  %v5538_v32 = vsub.f32 %v5537_v1, %v2884_v29 }
 0x316   : > { %5524 = vst [vmem:[#allocation53_spill] sm:$0xff] %v3686_v42  ;;  %v3704_v34 = vmul.f32 %v3110_v30, %v5532_v7  ;;  %v5535_v42 = vsub.f32 %v5534_v0, %v2884_v29  ;;  %v5543_v7 = vld [vmem:[#allocation71_spill] sm:$0xff] }
 0x317   : > { %v3698_v60 = vmul.f32 %v3110_v30, %v5529_v11  ;;  %v3716_v15 = vmul.f32 %v3110_v30, %v5538_v32  ;;  %v5540_v11 = vld [vmem:[#allocation69_spill] sm:$0xff]  ;;  %v5547_v32 = vld [vmem:[#allocation72_spill] sm:$0xff] }
 0x318   : > { %5533 = vst [vmem:[#allocation56_spill] sm:$0xff] %v3704_v34  ;;  %v3710_v53 = vmul.f32 %v3110_v30, %v5535_v42  ;;  %v5544_v34 = vsub.f32 %v5543_v7, %v2884_v29  ;;  %v5545_v42 = vld [vmem:[#allocation70_spill] sm:$0xff]  ;;  %v3752_v7 = vmul.f32 %v3104_v46, %v3134_v31 }
 0x319   : > { %5530 = vst [vmem:[#allocation54_spill] sm:$0xff] %v3698_v60  ;;  %5539 = vst [vmem:[#allocation59_spill] sm:$0xff] %v3716_v15  ;;  %v5541_v60 = vsub.f32 %v5540_v11, %v2884_v29  ;;  %v5548_v15 = vsub.f32 %v5547_v32, %v2884_v29  ;;  %v5558_v32 = vld [vmem:[#allocation48_spill] sm:$0xff] }
 0x31a   : > { %5536 = vst [vmem:[#allocation57_spill] sm:$0xff] %v3710_v53  ;;  %v3728_v0 = vmul.f32 %v3110_v30, %v5544_v34  ;;  %v5546_v53 = vsub.f32 %v5545_v42, %v2884_v29  ;;  %v3748_v34 = vmul.f32 %v3102_v3, %v3128_v45  ;;  %v3768_v29 = vmul.f32 %v3104_v46, %v3158_v2  ;;  %v5552_v45 = vld [vmem:[#allocation8_spill] sm:$0xff]  ;;  %v5556_v42 = vld [vmem:[#allocation45_spill] sm:$0xff] }
 0x31b   : > { %v3722_v36 = vmul.f32 %v3110_v30, %v5541_v60  ;;  %v3740_v11 = vmul.f32 %v3110_v30, %v5548_v15  ;;  %v5549_v60 = vld [vmem:[#allocation2_spill] sm:$0xff]  ;;  %v3772_v31 = vmul.f32 %v3106_v41, %v5552_v45  ;;  %v5554_v15 = vld [vmem:[#allocation35_spill] sm:$0xff] }
 0x31c   : > { %v3734_v1 = vmul.f32 %v3110_v30, %v5546_v53  ;;  %v3756_v53 = vmul.f32 %v3106_v41, %v3140_v54  ;;  %v3760_v30 = vmul.f32 %v5549_v60, %v3146_v50  ;;  %5551 = vst [vmem:[#allocation61_spill] sm:$0xff] %v3768_v29  ;;  %v3776_v54 = vmul.f32 %v5549_v60, %v5554_v15  ;;  %v5562_v29 = vld [vmem:[#allocation49_spill] sm:$0xff] }
 0x31d   : > { %5542 = vst [vmem:[#allocation58_spill] sm:$0xff] %v3722_v36  ;;  %v3744_v36 = vmul.f32 %v5549_v60, %v3122_v48  ;;  %v3764_v48 = vmul.f32 %v3102_v3, %v3152_v40  ;;  %5553 = vst [vmem:[#allocation63_spill] sm:$0xff] %v3772_v31  ;;  %v3780_v50 = vmul.f32 %v3102_v3, %v5556_v42  ;;  %v5564_v31 = vld [vmem:[#allocation50_spill] sm:$0xff] }
 0x31e   : > { %5555 = vst [vmem:[#allocation62_spill] sm:$0xff] %v3776_v54  ;;  %v3784_v40 = vmul.f32 %v3104_v46, %v5558_v32  ;;  %v3792_v45 = vmul.f32 %v5549_v60, %v5562_v29  ;;  %v3796_v15 = vmul.f32 %v3102_v3, %v5564_v31  ;;  %v5566_v54 = vld [vmem:[#allocation51_spill] sm:$0xff] }
 0x31f   : > { %5550 = vst [vmem:[#allocation60_spill] sm:$0xff] %v3764_v48  ;;  %5557 = vst [vmem:[#allocation64_spill] sm:$0xff] %v3780_v50  ;;  %v5560_v48 = vld [vmem:[#allocation47_spill] sm:$0xff]  ;;  %v3800_v42 = vmul.f32 %v3104_v46, %v5566_v54  ;;  %v5568_v50 = vld [vmem:[#allocation52_spill] sm:$0xff] }
 0x320   : > { %5559 = vst [vmem:[#allocation65_spill] sm:$0xff] %v3784_v40  ;;  %v3788_v2 = vmul.f32 %v3106_v41, %v5560_v48  ;;  %5563 = vst [vmem:[#allocation66_spill] sm:$0xff] %v3792_v45  ;;  %v3804_v32 = vmul.f32 %v3106_v41, %v5568_v50  ;;  %v5570_v40 = vld [vmem:[#allocation7_spill] sm:$0xff]  ;;  %v5574_v45 = vld [vmem:[#allocation10_spill] sm:$0xff] }
 0x321   : > { %5565 = vst [vmem:[#allocation68_spill] sm:$0xff] %v3796_v15  ;;  %5567 = vst [vmem:[#allocation69_spill] sm:$0xff] %v3800_v42  ;;  %v3808_v48 = vmul.f32 %v5549_v60, %v5570_v40  ;;  %v3816_v31 = vmul.f32 %v3104_v46, %v5574_v45  ;;  %v5576_v15 = vld [vmem:[#allocation12_spill] sm:$0xff]  ;;  %v5578_v42 = vld [vmem:[#allocation11_spill] sm:$0xff] }
 0x322   : > { %5561 = vst [vmem:[#allocation67_spill] sm:$0xff] %v3788_v2  ;;  %5569 = vst [vmem:[#allocation71_spill] sm:$0xff] %v3804_v32  ;;  %v5572_v2 = vld [vmem:[#allocation9_spill] sm:$0xff]  ;;  %v3820_v54 = vmul.f32 %v3106_v41, %v5576_v15  ;;  %v3824_v50 = vmul.f32 %v5549_v60, %v5578_v42 }
 0x323   : > { %5571 = vst [vmem:[#allocation70_spill] sm:$0xff] %v3808_v48  ;;  %v3812_v29 = vmul.f32 %v3102_v3, %v5572_v2  ;;  %5575 = vst [vmem:[#allocation2_spill] sm:$0xff] %v3816_v31  ;;  %v5580_v32 = vld [vmem:[#allocation13_spill] sm:$0xff]  ;;  %v5582_v48 = vld [vmem:[#allocation14_spill] sm:$0xff] }
 0x324   : > { %5577 = vst [vmem:[#allocation8_spill] sm:$0xff] %v3820_v54  ;;  %5579 = vst [vmem:[#allocation35_spill] sm:$0xff] %v3824_v50  ;;  %v3828_v40 = vmul.f32 %v3102_v3, %v5580_v32  ;;  %v3832_v2 = vmul.f32 %v3104_v46, %v5582_v48  ;;  %v5586_v31 = vld [vmem:[#allocation15_spill] sm:$0xff]  ;;  %v5587_v54 = vld [vmem:[#allocation17_spill] sm:$0xff] }
 0x325   : > { %5573 = vst [vmem:[#allocation72_spill] sm:$0xff] %v3812_v29  ;;  %v5584_v29 = vld [vmem:[#allocation16_spill] sm:$0xff]  ;;  %v3840_v15 = vmul.f32 %v5549_v60, %v5586_v31  ;;  %v3844_v42 = vmul.f32 %v3102_v3, %v5587_v54  ;;  %v5589_v50 = vld [vmem:[#allocation18_spill] sm:$0xff]  ;;  %v3864_v54 = vmul.f32 %v3104_v46, %v3302_v26 }
 0x326   : > { %5581 = vst [vmem:[#allocation45_spill] sm:$0xff] %v3828_v40  ;;  %5583 = vst [vmem:[#allocation48_spill] sm:$0xff] %v3832_v2  ;;  %v3836_v45 = vmul.f32 %v3106_v41, %v5584_v29  ;;  %v3848_v32 = vmul.f32 %v3104_v46, %v5589_v50  ;;  %v5591_v40 = vld [vmem:[#allocation20_spill] sm:$0xff]  ;;  %v5593_v2 = vld [vmem:[#allocation19_spill] sm:$0xff] }
 0x327   : > { %5588 = vst [vmem:[#allocation49_spill] sm:$0xff] %v3844_v42  ;;  %v3852_v48 = vmul.f32 %v3106_v41, %v5591_v40  ;;  %v3856_v29 = vmul.f32 %v5549_v60, %v5593_v2  ;;  %5597 = vst [vmem:[#allocation9_spill] sm:$0xff] %v3864_v54  ;;  %v5598_v42 = vld [vmem:[#allocation22_spill] sm:$0xff]  ;;  %v5606_v54 = vld [vmem:[#allocation28_spill] sm:$0xff] }
 0x328   : > { %5585 = vst [vmem:[#allocation47_spill] sm:$0xff] %v3836_v45  ;;  %5590 = vst [vmem:[#allocation50_spill] sm:$0xff] %v3848_v32  ;;  %v5595_v45 = vld [vmem:[#allocation21_spill] sm:$0xff]  ;;  %v3868_v50 = vmul.f32 %v3106_v41, %v5598_v42  ;;  %v5600_v32 = vld [vmem:[#allocation24_spill] sm:$0xff]  ;;  %v3888_v42 = vmul.f32 %v5549_v60, %v5606_v54  ;;  %v3908_v54 = vmul.f32 %v3102_v3, %v3368_v28 }
 0x329   : > { %5592 = vst [vmem:[#allocation51_spill] sm:$0xff] %v3852_v48  ;;  %5594 = vst [vmem:[#allocation52_spill] sm:$0xff] %v3856_v29  ;;  %v3860_v31 = vmul.f32 %v3102_v3, %v5595_v45  ;;  %v3872_v40 = vmul.f32 %v5549_v60, %v5600_v32  ;;  %v5602_v48 = vld [vmem:[#allocation23_spill] sm:$0xff]  ;;  %v5603_v29 = vld [vmem:[#allocation25_spill] sm:$0xff]  ;;  %v3928_v28 = vmul.f32 %v3104_v46, %v3398_v25 }
 0x32a   : > { %5599 = vst [vmem:[#allocation10_spill] sm:$0xff] %v3868_v50  ;;  %v3876_v2 = vmul.f32 %v3102_v3, %v5602_v48  ;;  %v3880_v45 = vmul.f32 %v3104_v46, %v5603_v29  ;;  %v5607_v50 = vld [vmem:[#allocation27_spill] sm:$0xff]  ;;  %v3900_v29 = vmul.f32 %v3106_v41, %v3356_v24  ;;  %v3920_v24 = vmul.f32 %v5549_v60, %v3386_v44 }
 0x32b   : > { %5596 = vst [vmem:[#allocation7_spill] sm:$0xff] %v3860_v31  ;;  %5601 = vst [vmem:[#allocation12_spill] sm:$0xff] %v3872_v40  ;;  %v5605_v31 = vld [vmem:[#allocation26_spill] sm:$0xff]  ;;  %v3892_v32 = vmul.f32 %v3102_v3, %v5607_v50  ;;  %v5608_v40 = vld [vmem:[#allocation29_spill] sm:$0xff]  ;;  %v3912_v50 = vmul.f32 %v3104_v46, %v3374_v55  ;;  %v3932_v55 = vmul.f32 %v3106_v41, %v3404_v21 }
 0x32c   : > { %5604 = vst [vmem:[#allocation11_spill] sm:$0xff] %v3880_v45  ;;  %v3884_v26 = vmul.f32 %v3106_v41, %v5605_v31  ;;  %v3896_v48 = vmul.f32 %v3104_v46, %v5608_v40  ;;  %v5609_v45 = vld [vmem:[#allocation30_spill] sm:$0xff]  ;;  %v3916_v40 = vmul.f32 %v3106_v41, %v3380_v35  ;;  %v3936_v35 = vmul.f32 %v5549_v60, %v3410_v20 }
 0x32d   : > { %v3904_v31 = vmul.f32 %v5549_v60, %v5609_v45  ;;  %v3924_v45 = vmul.f32 %v3102_v3, %v3392_v16  ;;  %v3940_v44 = vmul.f32 %v3102_v3, %v3416_v18  ;;  %v3944_v16 = vmul.f32 %v3104_v46, %v3422_v12 }
 0x32e   : > { %v3948_v25 = vmul.f32 %v3106_v41, %v3428_v14  ;;  %v3952_v21 = vmul.f32 %v5549_v60, %v3434_v23  ;;  %v3956_v20 = vmul.f32 %v3102_v3, %v3440_v13  ;;  %v3960_v18 = vmul.f32 %v3104_v46, %v3446_v39 }
 0x32f   : > { %v3964_v12 = vmul.f32 %v3106_v41, %v3452_v56  ;;  %v3968_v14 = vmul.f32 %v5549_v60, %v3458_v58  ;;  %v3972_v23 = vmul.f32 %v3102_v3, %v3464_v57  ;;  %v3976_v13 = vmul.f32 %v3104_v46, %v3470_v59 }
 0x330   : > { %v3980_v39 = vmul.f32 %v3106_v41, %v3476_v6  ;;  %v3984_v56 = vmul.f32 %v5549_v60, %v3482_v63  ;;  %v3988_v58 = vmul.f32 %v3102_v3, %v3488_v4  ;;  %v3996_v59 = vmul.f32 %v3106_v41, %v3500_v51 }
 0x331   : > { %5610 = vst [vmem:[#allocation13_spill] sm:$0xff] %v3968_v14  ;;  %v5611_v14 = vld [vmem:[#allocation32_spill] sm:$0xff]  ;;  %v4000_v6 = vmul.f32 %v5549_v60, %v3506_v10  ;;  %v4004_v63 = vmul.f32 %v3102_v3, %v3512_v8  ;;  %v4008_v4 = vmul.f32 %v3104_v46, %v3518_v9  ;;  %v4016_v51 = vmul.f32 %v5549_v60, %v3530_v37 }
 0x332   : > { %v3992_v57 = vmul.f32 %v3104_v46, %v5611_v14  ;;  %v4012_v14 = vmul.f32 %v3106_v41, %v3524_v62  ;;  %v4020_v10 = vmul.f32 %v3102_v3, %v3536_v22  ;;  %v4024_v8 = vmul.f32 %v3104_v46, %v3542_v38 }
 0x333   : > { %v4028_v9 = vmul.f32 %v3106_v41, %v3548_v17  ;;  %v4032_v62 = vmul.f32 %v5549_v60, %v3554_v5  ;;  %v4036_v37 = vmul.f32 %v3102_v3, %v3560_v61  ;;  %v4040_v22 = vmul.f32 %v3104_v46, %v3566_v52 }
 0x334   : > { %v4044_v38 = vmul.f32 %v3106_v41, %v3572_v49  ;;  %v4048_v17 = vmul.f32 %v5549_v60, %v3578_v43  ;;  %v4052_v5 = vmul.f32 %v3102_v3, %v3584_v47  ;;  %v4056_v61 = vmul.f32 %v3104_v46, %v3590_v19 }
 0x335   : > { %v4060_v52 = vmul.f32 %v3106_v41, %v3596_v27  ;;  %v4064_v49 = vmul.f32 %v5549_v60, %v3602_v33 }
 0x336   : > { %5612 = vst [vmem:[#allocation14_spill] sm:$0xff] %v4044_v38  ;;  %5613 = vst [vmem:[#allocation16_spill] sm:$0xff] %v4048_v17  ;;  %v5618_v38 = vld [vmem:[#allocation31_spill] sm:$0xff]  ;;  %v5620_v17 = vld [vmem:[#allocation33_spill] sm:$0xff] }
 0x337   : > { %5614 = vst [vmem:[#allocation15_spill] sm:$0xff] %v4052_v5  ;;  %5615 = vst [vmem:[#allocation17_spill] sm:$0xff] %v4056_v61  ;;  %v4068_v43 = vmul.f32 %v3102_v3, %v5618_v38  ;;  %v4072_v47 = vmul.f32 %v3104_v46, %v5620_v17  ;;  %v5622_v5 = vld [vmem:[#allocation34_spill] sm:$0xff]  ;;  %v5624_v61 = vld [vmem:[#allocation36_spill] sm:$0xff] }
 0x338   : > { %5616 = vst [vmem:[#allocation18_spill] sm:$0xff] %v4060_v52  ;;  %5617 = vst [vmem:[#allocation20_spill] sm:$0xff] %v4064_v49  ;;  %v4076_v19 = vmul.f32 %v3106_v41, %v5622_v5  ;;  %v4080_v27 = vmul.f32 %v5549_v60, %v5624_v61  ;;  %v5626_v52 = vld [vmem:[#allocation37_spill] sm:$0xff]  ;;  %v5628_v49 = vld [vmem:[#allocation38_spill] sm:$0xff] }
 0x339   : > { %5619 = vst [vmem:[#allocation19_spill] sm:$0xff] %v4068_v43  ;;  %5621 = vst [vmem:[#allocation21_spill] sm:$0xff] %v4072_v47  ;;  %v4084_v33 = vmul.f32 %v3102_v3, %v5626_v52  ;;  %v4088_v38 = vmul.f32 %v3104_v46, %v5628_v49  ;;  %v5630_v43 = vld [vmem:[#allocation40_spill] sm:$0xff]  ;;  %v5632_v47 = vld [vmem:[#allocation39_spill] sm:$0xff] }
 0x33a   : > { %5623 = vst [vmem:[#allocation22_spill] sm:$0xff] %v4076_v19  ;;  %5625 = vst [vmem:[#allocation24_spill] sm:$0xff] %v4080_v27  ;;  %v4092_v17 = vmul.f32 %v3106_v41, %v5630_v43  ;;  %v4096_v5 = vmul.f32 %v5549_v60, %v5632_v47  ;;  %v5634_v19 = vld [vmem:[#allocation41_spill] sm:$0xff]  ;;  %v5636_v27 = vld [vmem:[#allocation42_spill] sm:$0xff] }
 0x33b   : > { %5627 = vst [vmem:[#allocation23_spill] sm:$0xff] %v4084_v33  ;;  %5629 = vst [vmem:[#allocation25_spill] sm:$0xff] %v4088_v38  ;;  %v4100_v61 = vmul.f32 %v3102_v3, %v5634_v19  ;;  %v4104_v52 = vmul.f32 %v3104_v46, %v5636_v27  ;;  %v5638_v33 = vld [vmem:[#allocation44_spill] sm:$0xff]  ;;  %v5640_v38 = vld [vmem:[#allocation43_spill] sm:$0xff] }
 0x33c   : > { %5631 = vst [vmem:[#allocation26_spill] sm:$0xff] %v4092_v17  ;;  %5633 = vst [vmem:[#allocation28_spill] sm:$0xff] %v4096_v5  ;;  %v4108_v49 = vmul.f32 %v3106_v41, %v5638_v33  ;;  %v4112_v43 = vmul.f32 %v5549_v60, %v5640_v38  ;;  %v5642_v17 = vld [vmem:[#allocation46_spill] sm:$0xff]  ;;  %v5644_v5 = vld [vmem:[#allocation53_spill] sm:$0xff] }
 0x33d   : > { %5635 = vst [vmem:[#allocation27_spill] sm:$0xff] %v4100_v61  ;;  %5637 = vst [vmem:[#allocation29_spill] sm:$0xff] %v4104_v52  ;;  %v4116_v47 = vmul.f32 %v3102_v3, %v5642_v17  ;;  %v4120_v19 = vmul.f32 %v3104_v46, %v5644_v5  ;;  %v5646_v61 = vld [vmem:[#allocation55_spill] sm:$0xff]  ;;  %v5647_v52 = vld [vmem:[#allocation54_spill] sm:$0xff] }
 0x33e   : > { %5639 = vst [vmem:[#allocation30_spill] sm:$0xff] %v4108_v49  ;;  %5641 = vst [vmem:[#allocation32_spill] sm:$0xff] %v4112_v43  ;;  %v4124_v27 = vmul.f32 %v3106_v41, %v5646_v61  ;;  %v4128_v33 = vmul.f32 %v5549_v60, %v5647_v52  ;;  %v5648_v49 = vld [vmem:[#allocation56_spill] sm:$0xff]  ;;  %v5649_v43 = vld [vmem:[#allocation57_spill] sm:$0xff]  ;;  %v4148_v52 = vmul.f32 %v3102_v3, %v3728_v0 }
 0x33f   : > { %5643 = vst [vmem:[#allocation31_spill] sm:$0xff] %v4116_v47  ;;  %5645 = vst [vmem:[#allocation33_spill] sm:$0xff] %v4120_v19  ;;  %v4132_v38 = vmul.f32 %v3102_v3, %v5648_v49  ;;  %v4136_v17 = vmul.f32 %v3104_v46, %v5649_v43  ;;  %v5651_v47 = vld [vmem:[#allocation59_spill] sm:$0xff]  ;;  %v5653_v19 = vld [vmem:[#allocation58_spill] sm:$0xff]  ;;  %v4152_v49 = vmul.f32 %v3104_v46, %v3734_v1 }
 0x340   : > { %v4140_v5 = vmul.f32 %v3106_v41, %v5651_v47  ;;  %v4144_v61 = vmul.f32 %v5549_v60, %v5653_v19  ;;  %v4156_v43 = vmul.f32 %v3106_v41, %v3740_v11  ;;  %v5658_v19 = vld [vmem:[#allocation5_spill] sm:$0xff]  ;;  %v5660_v0 = vld [vmem:[#allocation6_spill] sm:$0xff]  ;;  %v5663_v1 = vld [vmem:[#allocation60_spill] sm:$0xff] }
 0x341   : > { %5650 = vst [vmem:[#allocation34_spill] sm:$0xff] %v4136_v17  ;;  %v5654_v17 = vld [vmem:[#allocation4_spill] sm:$0xff]  ;;  %v4168_v3 = vadd.f32 %v5658_v19, %v3752_v7  ;;  %v4172_v46 = vadd.f32 %v5660_v0, %v3756_v53  ;;  %v5665_v11 = vld [vmem:[#allocation61_spill] sm:$0xff] }
 0x342   : > { %5652 = vst [vmem:[#allocation36_spill] sm:$0xff] %v4140_v5  ;;  %v4160_v47 = vadd.f32 %v5654_v17, %v3744_v36  ;;  %v5656_v5 = vld [vmem:[#allocation3_spill] sm:$0xff]  ;;  %v4176_v41 = vadd.f32 %v5654_v17, %v3760_v30 }
 0x343   : > { %v4164_v60 = vadd.f32 %v5656_v5, %v3748_v34  ;;  %5659 = vst [vmem:[#allocation40_spill] sm:$0xff] %v4168_v3  ;;  %5661 = vst [vmem:[#allocation39_spill] sm:$0xff] %v4172_v46  ;;  %v4180_v36 = vadd.f32 %v5656_v5, %v5663_v1  ;;  %v4184_v34 = vadd.f32 %v5658_v19, %v5665_v11  ;;  %v5669_v3 = vld [vmem:[#allocation62_spill] sm:$0xff]  ;;  %v5671_v46 = vld [vmem:[#allocation64_spill] sm:$0xff] }
 0x344   : > { %5655 = vst [vmem:[#allocation37_spill] sm:$0xff] %v4160_v47  ;;  %5662 = vst [vmem:[#allocation41_spill] sm:$0xff] %v4176_v41  ;;  %v4192_v53 = vadd.f32 %v5654_v17, %v5669_v3  ;;  %v4196_v30 = vadd.f32 %v5656_v5, %v5671_v46  ;;  %v5673_v41 = vld [vmem:[#allocation65_spill] sm:$0xff] }
 0x345   : > { %5657 = vst [vmem:[#allocation38_spill] sm:$0xff] %v4164_v60  ;;  %5664 = vst [vmem:[#allocation42_spill] sm:$0xff] %v4180_v36  ;;  %v5667_v60 = vld [vmem:[#allocation63_spill] sm:$0xff]  ;;  %v4200_v1 = vadd.f32 %v5658_v19, %v5673_v41 }
 0x346   : > { %5666 = vst [vmem:[#allocation44_spill] sm:$0xff] %v4184_v34  ;;  %v4188_v7 = vadd.f32 %v5660_v0, %v5667_v60  ;;  %5670 = vst [vmem:[#allocation46_spill] sm:$0xff] %v4192_v53  ;;  %v5675_v36 = vld [vmem:[#allocation67_spill] sm:$0xff]  ;;  %v5677_v34 = vld [vmem:[#allocation66_spill] sm:$0xff] }
 0x347   : > { %5672 = vst [vmem:[#allocation53_spill] sm:$0xff] %v4196_v30  ;;  %5674 = vst [vmem:[#allocation55_spill] sm:$0xff] %v4200_v1  ;;  %v4204_v11 = vadd.f32 %v5660_v0, %v5675_v36  ;;  %v4208_v60 = vadd.f32 %v5654_v17, %v5677_v34  ;;  %v5681_v53 = vld [vmem:[#allocation69_spill] sm:$0xff]  ;;  %v5683_v30 = vld [vmem:[#allocation71_spill] sm:$0xff] }
 0x348   : > { %5668 = vst [vmem:[#allocation43_spill] sm:$0xff] %v4188_v7  ;;  %v5679_v7 = vld [vmem:[#allocation68_spill] sm:$0xff]  ;;  %v4216_v46 = vadd.f32 %v5658_v19, %v5681_v53  ;;  %v4220_v41 = vadd.f32 %v5660_v0, %v5683_v30  ;;  %v5685_v1 = vld [vmem:[#allocation70_spill] sm:$0xff] }
 0x349   : > { %5676 = vst [vmem:[#allocation54_spill] sm:$0xff] %v4204_v11  ;;  %5678 = vst [vmem:[#allocation56_spill] sm:$0xff] %v4208_v60  ;;  %v4212_v3 = vadd.f32 %v5656_v5, %v5679_v7  ;;  %v4224_v36 = vadd.f32 %v5654_v17, %v5685_v1  ;;  %v5687_v11 = vld [vmem:[#allocation72_spill] sm:$0xff]  ;;  %v5689_v60 = vld [vmem:[#allocation2_spill] sm:$0xff] }
 0x34a   : > { %5682 = vst [vmem:[#allocation59_spill] sm:$0xff] %v4216_v46  ;;  %5684 = vst [vmem:[#allocation58_spill] sm:$0xff] %v4220_v41  ;;  %v4228_v34 = vadd.f32 %v5656_v5, %v5687_v11  ;;  %v4232_v7 = vadd.f32 %v5658_v19, %v5689_v60  ;;  %v5692_v46 = vld [vmem:[#allocation35_spill] sm:$0xff]  ;;  %v5694_v41 = vld [vmem:[#allocation45_spill] sm:$0xff] }
 0x34b   : > { %5680 = vst [vmem:[#allocation57_spill] sm:$0xff] %v4212_v3  ;;  %5686 = vst [vmem:[#allocation4_spill] sm:$0xff] %v4224_v36  ;;  %v5690_v3 = vld [vmem:[#allocation8_spill] sm:$0xff]  ;;  %v4240_v30 = vadd.f32 %v5654_v17, %v5692_v46  ;;  %v4244_v1 = vadd.f32 %v5656_v5, %v5694_v41 }
 0x34c   : > { %5688 = vst [vmem:[#allocation3_spill] sm:$0xff] %v4228_v34  ;;  %v4236_v53 = vadd.f32 %v5660_v0, %v5690_v3  ;;  %v5696_v36 = vld [vmem:[#allocation48_spill] sm:$0xff]  ;;  %v5698_v34 = vld [vmem:[#allocation47_spill] sm:$0xff]  ;;  %v4256_v3 = vadd.f32 %v5654_v17, %v3840_v15 }
 0x34d   : > { %5693 = vst [vmem:[#allocation6_spill] sm:$0xff] %v4240_v30  ;;  %5695 = vst [vmem:[#allocation60_spill] sm:$0xff] %v4244_v1  ;;  %v4248_v11 = vadd.f32 %v5658_v19, %v5696_v36  ;;  %v4252_v60 = vadd.f32 %v5660_v0, %v5698_v34  ;;  %v5703_v30 = vld [vmem:[#allocation50_spill] sm:$0xff]  ;;  %v5705_v1 = vld [vmem:[#allocation51_spill] sm:$0xff] }
 0x34e   : > { %5691 = vst [vmem:[#allocation5_spill] sm:$0xff] %v4236_v53  ;;  %5700 = vst [vmem:[#allocation62_spill] sm:$0xff] %v4256_v3  ;;  %v5701_v53 = vld [vmem:[#allocation49_spill] sm:$0xff]  ;;  %v4264_v41 = vadd.f32 %v5658_v19, %v5703_v30  ;;  %v4268_v36 = vadd.f32 %v5660_v0, %v5705_v1 }
 0x34f   : > { %5697 = vst [vmem:[#allocation61_spill] sm:$0xff] %v4248_v11  ;;  %5699 = vst [vmem:[#allocation63_spill] sm:$0xff] %v4252_v60  ;;  %v4260_v46 = vadd.f32 %v5656_v5, %v5701_v53  ;;  %v5706_v11 = vld [vmem:[#allocation52_spill] sm:$0xff]  ;;  %v5708_v60 = vld [vmem:[#allocation7_spill] sm:$0xff] }
 0x350   : > { %5704 = vst [vmem:[#allocation65_spill] sm:$0xff] %v4264_v41  ;;  %v4272_v34 = vadd.f32 %v5654_v17, %v5706_v11  ;;  %v4276_v15 = vadd.f32 %v5656_v5, %v5708_v60  ;;  %v5709_v3 = vld [vmem:[#allocation9_spill] sm:$0xff]  ;;  %v5711_v41 = vld [vmem:[#allocation12_spill] sm:$0xff]  ;;  %v4292_v11 = vadd.f32 %v5656_v5, %v3876_v2  ;;  %v4312_v2 = vadd.f32 %v5658_v19, %v3896_v48 }
 0x351   : > { %5702 = vst [vmem:[#allocation64_spill] sm:$0xff] %v4260_v46  ;;  %v4280_v53 = vadd.f32 %v5658_v19, %v5709_v3  ;;  %v5710_v46 = vld [vmem:[#allocation10_spill] sm:$0xff]  ;;  %v4288_v1 = vadd.f32 %v5654_v17, %v5711_v41  ;;  %v4300_v3 = vadd.f32 %v5660_v0, %v3884_v26  ;;  %v4308_v41 = vadd.f32 %v5656_v5, %v3892_v32 }
 0x352   : > { %5707 = vst [vmem:[#allocation67_spill] sm:$0xff] %v4272_v34  ;;  %v4284_v30 = vadd.f32 %v5660_v0, %v5710_v46  ;;  %v5712_v34 = vld [vmem:[#allocation11_spill] sm:$0xff]  ;;  %v4304_v46 = vadd.f32 %v5654_v17, %v3888_v42  ;;  %v4320_v26 = vadd.f32 %v5654_v17, %v3904_v31  ;;  %v4324_v42 = vadd.f32 %v5656_v5, %v3908_v54 }
 0x353   : > { %v4296_v60 = vadd.f32 %v5658_v19, %v5712_v34  ;;  %v4316_v34 = vadd.f32 %v5660_v0, %v3900_v29  ;;  %v4328_v32 = vadd.f32 %v5658_v19, %v3912_v50  ;;  %v4332_v48 = vadd.f32 %v5660_v0, %v3916_v40 }
 0x354   : > { %v4336_v29 = vadd.f32 %v5654_v17, %v3920_v24  ;;  %v4340_v31 = vadd.f32 %v5656_v5, %v3924_v45  ;;  %v4344_v54 = vadd.f32 %v5658_v19, %v3928_v28  ;;  %v4348_v50 = vadd.f32 %v5660_v0, %v3932_v55 }
 0x355   : > { %5713 = vst [vmem:[#allocation66_spill] sm:$0xff] %v4316_v34  ;;  %v4352_v40 = vadd.f32 %v5654_v17, %v3936_v35  ;;  %v4356_v24 = vadd.f32 %v5656_v5, %v3940_v44  ;;  %v4360_v45 = vadd.f32 %v5658_v19, %v3944_v16  ;;  %v4364_v28 = vadd.f32 %v5660_v0, %v3948_v25 }
 0x356   : > { %v4368_v55 = vadd.f32 %v5654_v17, %v3952_v21  ;;  %v4372_v35 = vadd.f32 %v5656_v5, %v3956_v20  ;;  %v4376_v44 = vadd.f32 %v5658_v19, %v3960_v18  ;;  %v4380_v16 = vadd.f32 %v5660_v0, %v3964_v12  ;;  %v5804_v47 = vld [vmem:[#allocation61_spill] sm:$0xff] }
 0x357   : > { %5714 = vst [vmem:[#allocation68_spill] sm:$0xff] %v4360_v45  ;;  %v5715_v45 = vld [vmem:[#allocation13_spill] sm:$0xff]  ;;  %v4388_v21 = vadd.f32 %v5656_v5, %v3972_v23  ;;  %v4392_v20 = vadd.f32 %v5658_v19, %v3976_v13  ;;  %v4396_v18 = vadd.f32 %v5660_v0, %v3980_v39  ;;  %v4400_v12 = vadd.f32 %v5654_v17, %v3984_v56 }
 0x358   : > { %v4384_v25 = vadd.f32 %v5654_v17, %v5715_v45  ;;  %v4404_v45 = vadd.f32 %v5656_v5, %v3988_v58  ;;  %v4408_v23 = vadd.f32 %v5658_v19, %v3992_v57  ;;  %v4412_v13 = vadd.f32 %v5660_v0, %v3996_v59 }
 0x359   : > { %5716 = vst [vmem:[#allocation69_spill] sm:$0xff] %v4392_v20  ;;  %5717 = vst [vmem:[#allocation71_spill] sm:$0xff] %v4396_v18  ;;  %v4416_v39 = vadd.f32 %v5654_v17, %v4000_v6  ;;  %v4420_v56 = vadd.f32 %v5656_v5, %v4004_v63  ;;  %v4424_v58 = vadd.f32 %v5658_v19, %v4008_v4  ;;  %v5865_v18 = vld [vmem:[#allocation54_spill] sm:$0xff] }
 0x35a   : > { %5718 = vst [vmem:[#allocation70_spill] sm:$0xff] %v4400_v12  ;;  %5719 = vst [vmem:[#allocation72_spill] sm:$0xff] %v4404_v45  ;;  %v4428_v57 = vadd.f32 %v5660_v0, %v4012_v14  ;;  %v4432_v59 = vadd.f32 %v5654_v17, %v4016_v51  ;;  %v4436_v6 = vadd.f32 %v5656_v5, %v4020_v10 }
 0x35b   : > { %5720 = vst [vmem:[#allocation2_spill] sm:$0xff] %v4408_v23  ;;  %5721 = vst [vmem:[#allocation8_spill] sm:$0xff] %v4412_v13  ;;  %v4440_v63 = vadd.f32 %v5658_v19, %v4024_v8  ;;  %v4444_v4 = vadd.f32 %v5660_v0, %v4028_v9  ;;  %v4448_v14 = vadd.f32 %v5654_v17, %v4032_v62  ;;  %v5850_v13 = vld [vmem:[#allocation39_spill] sm:$0xff] }
 0x35c   : > { %5722 = vst [vmem:[#allocation35_spill] sm:$0xff] %v4416_v39  ;;  %5723 = vst [vmem:[#allocation45_spill] sm:$0xff] %v4420_v56  ;;  %v4452_v51 = vadd.f32 %v5656_v5, %v4036_v37  ;;  %v4456_v10 = vadd.f32 %v5658_v19, %v4040_v22  ;;  %v5851_v45 = vmax.f32 %v5850_v13, 0.0  ;;  %v5856_v39 = vld [vmem:[#allocation44_spill] sm:$0xff]  ;;  %v5866_v13 = vmax.f32 %v5865_v18, 0.0 }
 0x35d   : > { %5724 = vst [vmem:[#allocation48_spill] sm:$0xff] %v4424_v58  ;;  %5725 = vst [vmem:[#allocation47_spill] sm:$0xff] %v4428_v57  ;;  %v5857_v56 = vmax.f32 %v5856_v39, 0.0 }
 0x35e   : > { %5726 = vst [vmem:[#allocation49_spill] sm:$0xff] %v4432_v59  ;;  %5727 = vst [vmem:[#allocation50_spill] sm:$0xff] %v4436_v6  ;;  %v5733_v6 = vld [vmem:[#allocation14_spill] sm:$0xff]  ;;  %v5810_v34 = vld [vmem:[#allocation68_spill] sm:$0xff] }
 0x35f   : > { %5728 = vst [vmem:[#allocation51_spill] sm:$0xff] %v4440_v63  ;;  %5729 = vst [vmem:[#allocation52_spill] sm:$0xff] %v4444_v4  ;;  %v4460_v8 = vadd.f32 %v5660_v0, %v5733_v6  ;;  %v5735_v63 = vld [vmem:[#allocation16_spill] sm:$0xff]  ;;  %v5737_v4 = vld [vmem:[#allocation15_spill] sm:$0xff] }
 0x360   : > { %5730 = vst [vmem:[#allocation7_spill] sm:$0xff] %v4448_v14  ;;  %5731 = vst [vmem:[#allocation9_spill] sm:$0xff] %v4452_v51  ;;  %v4464_v9 = vadd.f32 %v5654_v17, %v5735_v63  ;;  %v4468_v62 = vadd.f32 %v5656_v5, %v5737_v4  ;;  %v5739_v14 = vld [vmem:[#allocation17_spill] sm:$0xff]  ;;  %v5741_v51 = vld [vmem:[#allocation18_spill] sm:$0xff] }
 0x361   : > { %5732 = vst [vmem:[#allocation10_spill] sm:$0xff] %v4456_v10  ;;  %5734 = vst [vmem:[#allocation12_spill] sm:$0xff] %v4460_v8  ;;  %v4472_v37 = vadd.f32 %v5658_v19, %v5739_v14  ;;  %v4476_v22 = vadd.f32 %v5660_v0, %v5741_v51  ;;  %v5743_v10 = vld [vmem:[#allocation20_spill] sm:$0xff]  ;;  %v5745_v8 = vld [vmem:[#allocation19_spill] sm:$0xff] }
 0x362   : > { %5736 = vst [vmem:[#allocation11_spill] sm:$0xff] %v4464_v9  ;;  %5738 = vst [vmem:[#allocation13_spill] sm:$0xff] %v4468_v62  ;;  %v4480_v6 = vadd.f32 %v5654_v17, %v5743_v10  ;;  %v4484_v63 = vadd.f32 %v5656_v5, %v5745_v8  ;;  %v5747_v9 = vld [vmem:[#allocation21_spill] sm:$0xff]  ;;  %v5749_v62 = vld [vmem:[#allocation22_spill] sm:$0xff] }
 0x363   : > { %5740 = vst [vmem:[#allocation14_spill] sm:$0xff] %v4472_v37  ;;  %5742 = vst [vmem:[#allocation16_spill] sm:$0xff] %v4476_v22  ;;  %v4488_v4 = vadd.f32 %v5658_v19, %v5747_v9  ;;  %v4492_v14 = vadd.f32 %v5660_v0, %v5749_v62  ;;  %v5751_v37 = vld [vmem:[#allocation24_spill] sm:$0xff]  ;;  %v5753_v22 = vld [vmem:[#allocation23_spill] sm:$0xff] }
 0x364   : > { %5744 = vst [vmem:[#allocation15_spill] sm:$0xff] %v4480_v6  ;;  %5746 = vst [vmem:[#allocation17_spill] sm:$0xff] %v4484_v63  ;;  %v4496_v51 = vadd.f32 %v5654_v17, %v5751_v37  ;;  %v4500_v10 = vadd.f32 %v5656_v5, %v5753_v22  ;;  %v5755_v6 = vld [vmem:[#allocation25_spill] sm:$0xff]  ;;  %v5757_v63 = vld [vmem:[#allocation26_spill] sm:$0xff] }
 0x365   : > { %5748 = vst [vmem:[#allocation18_spill] sm:$0xff] %v4488_v4  ;;  %5750 = vst [vmem:[#allocation20_spill] sm:$0xff] %v4492_v14  ;;  %v4504_v8 = vadd.f32 %v5658_v19, %v5755_v6  ;;  %v4508_v9 = vadd.f32 %v5660_v0, %v5757_v63  ;;  %v5759_v4 = vld [vmem:[#allocation28_spill] sm:$0xff]  ;;  %v5761_v14 = vld [vmem:[#allocation27_spill] sm:$0xff] }
 0x366   : > { %5752 = vst [vmem:[#allocation19_spill] sm:$0xff] %v4496_v51  ;;  %5754 = vst [vmem:[#allocation21_spill] sm:$0xff] %v4500_v10  ;;  %v4512_v62 = vadd.f32 %v5654_v17, %v5759_v4  ;;  %v4516_v37 = vadd.f32 %v5656_v5, %v5761_v14  ;;  %v5763_v51 = vld [vmem:[#allocation29_spill] sm:$0xff]  ;;  %v5765_v10 = vld [vmem:[#allocation30_spill] sm:$0xff] }
 0x367   : > { %5756 = vst [vmem:[#allocation22_spill] sm:$0xff] %v4504_v8  ;;  %5758 = vst [vmem:[#allocation24_spill] sm:$0xff] %v4508_v9  ;;  %v4520_v22 = vadd.f32 %v5658_v19, %v5763_v51  ;;  %v4524_v6 = vadd.f32 %v5660_v0, %v5765_v10  ;;  %v5767_v8 = vld [vmem:[#allocation32_spill] sm:$0xff]  ;;  %v5769_v9 = vld [vmem:[#allocation31_spill] sm:$0xff]  ;;  %v4540_v51 = vadd.f32 %v5660_v0, %v4124_v27 }
 0x368   : > { %5760 = vst [vmem:[#allocation23_spill] sm:$0xff] %v4512_v62  ;;  %5762 = vst [vmem:[#allocation25_spill] sm:$0xff] %v4516_v37  ;;  %v4528_v63 = vadd.f32 %v5654_v17, %v5767_v8  ;;  %v4532_v4 = vadd.f32 %v5656_v5, %v5769_v9  ;;  %v5771_v62 = vld [vmem:[#allocation33_spill] sm:$0xff]  ;;  %v4544_v10 = vadd.f32 %v5654_v17, %v4128_v33  ;;  %v5846_v37 = vld [vmem:[#allocation38_spill] sm:$0xff] }
 0x369   : > { %5764 = vst [vmem:[#allocation26_spill] sm:$0xff] %v4520_v22  ;;  %5766 = vst [vmem:[#allocation28_spill] sm:$0xff] %v4524_v6  ;;  %v4536_v14 = vadd.f32 %v5658_v19, %v5771_v62  ;;  %v4548_v8 = vadd.f32 %v5656_v5, %v4132_v38  ;;  %v4560_v27 = vadd.f32 %v5654_v17, %v4144_v61  ;;  %v5807_v17 = vld [vmem:[#allocation64_spill] sm:$0xff]  ;;  %v5815_v61 = vld [vmem:[#allocation9_spill] sm:$0xff] }
 0x36a   : > { %5768 = vst [vmem:[#allocation27_spill] sm:$0xff] %v4528_v63  ;;  %5770 = vst [vmem:[#allocation29_spill] sm:$0xff] %v4532_v4  ;;  %v5776_v63 = vld [vmem:[#allocation34_spill] sm:$0xff]  ;;  %v5778_v4 = vld [vmem:[#allocation36_spill] sm:$0xff]  ;;  %v4564_v33 = vadd.f32 %v5656_v5, %v4148_v52  ;;  %v4568_v38 = vadd.f32 %v5658_v19, %v4152_v49 }
 0x36b   : > { %5772 = vst [vmem:[#allocation30_spill] sm:$0xff] %v4536_v14  ;;  %5773 = vst [vmem:[#allocation32_spill] sm:$0xff] %v4540_v51  ;;  %v4552_v9 = vadd.f32 %v5658_v19, %v5776_v63  ;;  %v4556_v62 = vadd.f32 %v5660_v0, %v5778_v4  ;;  %v4572_v63 = vadd.f32 %v5660_v0, %v4156_v43  ;;  %v5790_v49 = vld [vmem:[#allocation43_spill] sm:$0xff]  ;;  %v5799_v5 = vld [vmem:[#allocation4_spill] sm:$0xff] }
 0x36c   : > { %5774 = vst [vmem:[#allocation31_spill] sm:$0xff] %v4544_v10  ;;  %5775 = vst [vmem:[#allocation33_spill] sm:$0xff] %v4548_v8  ;;  %v5802_v43 = vld [vmem:[#allocation6_spill] sm:$0xff]  ;;  %v5805_v4 = vld [vmem:[#allocation63_spill] sm:$0xff]  ;;  %v5858_v0 = vmax.f32 %v5790_v49, 0.0 }
 0x36d   : > { %5777 = vst [vmem:[#allocation34_spill] sm:$0xff] %v4552_v9  ;;  %5779 = vst [vmem:[#allocation36_spill] sm:$0xff] %v4556_v62  ;;  %v5806_v8 = vld [vmem:[#allocation62_spill] sm:$0xff]  ;;  %v5844_v59 = vld [vmem:[#allocation37_spill] sm:$0xff]  ;;  %v5847_v9 = vmax.f32 %v5846_v37, 0.0 }
 0x36e   : > { %5780 = vst [vmem:[#allocation73_spill] sm:$0xff] %v4560_v27  ;;  %5781 = vst [vmem:[#allocation74_spill] sm:$0xff] %v4564_v33  ;;  %v5808_v27 = vld [vmem:[#allocation65_spill] sm:$0xff]  ;;  %v5809_v33 = vld [vmem:[#allocation67_spill] sm:$0xff]  ;;  %v5845_v12 = vmax.f32 %v5844_v59, 0.0  ;;  %v2140_v6 = vpack.c.bf16 %v5858_v0, %v5857_v56 }
 0x36f   : > { %5782 = vst [vmem:[#allocation75_spill] sm:$0xff] %v4568_v38  ;;  %5783 = vst [vmem:[#allocation76_spill] sm:$0xff] %v4572_v63  ;;  %v5801_v38 = vld [vmem:[#allocation5_spill] sm:$0xff]  ;;  %v5803_v63 = vld [vmem:[#allocation60_spill] sm:$0xff] }
 0x370   : > { %v2137_v22 = vpack.c.bf16 %v5847_v9, %v5845_v12  ;;  %v5848_v19 = vld [vmem:[#allocation40_spill] sm:$0xff]  ;;  %v5852_v51 = vld [vmem:[#allocation41_spill] sm:$0xff]  ;;  %v5854_v14 = vld [vmem:[#allocation42_spill] sm:$0xff]  ;;  %1916 = vst [vmem:[%s4678_s21 + $0x18] sm:$0xff] %v2140_v6  ;;  %v5891_v6 = vmax.f32 %v4284_v30, 0.0  ;;  %v5896_v30 = vmax.f32 %v4304_v46, 0.0 }
 0x371   : > { %v5849_v10 = vmax.f32 %v5848_v19, 0.0  ;;  %v5853_v57 = vmax.f32 %v5852_v51, 0.0  ;;  %v5855_v52 = vmax.f32 %v5854_v14, 0.0  ;;  %v5859_v59 = vld [vmem:[#allocation46_spill] sm:$0xff]  ;;  %v5861_v37 = vld [vmem:[#allocation53_spill] sm:$0xff]  ;;  %v5863_v9 = vld [vmem:[#allocation55_spill] sm:$0xff] }
 0x372   : > { %v5860_v62 = vmax.f32 %v5859_v59, 0.0  ;;  %v5862_v20 = vmax.f32 %v5861_v37, 0.0  ;;  %v5864_v19 = vmax.f32 %v5863_v9, 0.0  ;;  %v5867_v51 = vld [vmem:[#allocation56_spill] sm:$0xff]  ;;  %v5869_v14 = vld [vmem:[#allocation57_spill] sm:$0xff]  ;;  %v5873_v56 = vld [vmem:[#allocation58_spill] sm:$0xff]  ;;  %1913 = vst [vmem:[%s4678_s21] sm:$0xff] %v2137_v22 }
 0x373   : > { %v2138_v23 = vpack.c.bf16 %v5851_v45, %v5849_v10  ;;  %v2139_v58 = vpack.c.bf16 %v5855_v52, %v5853_v57  ;;  %v5868_v10 = vmax.f32 %v5867_v51, 0.0  ;;  %v5870_v57 = vmax.f32 %v5869_v14, 0.0  ;;  %v5871_v52 = vld [vmem:[#allocation59_spill] sm:$0xff] }
 0x374   : > { %v2141_v12 = vpack.c.bf16 %v5862_v20, %v5860_v62  ;;  %v2142_v45 = vpack.c.bf16 %v5866_v13, %v5864_v19  ;;  %v5872_v49 = vmax.f32 %v5871_v52, 0.0  ;;  %v5874_v0 = vmax.f32 %v5873_v56, 0.0  ;;  %v5876_v62 = vld [vmem:[#allocation3_spill] sm:$0xff] }
 0x375   : > { %v2143_v39 = vpack.c.bf16 %v5870_v57, %v5868_v10  ;;  %v5875_v20 = vmax.f32 %v5799_v5, 0.0  ;;  %v5877_v37 = vmax.f32 %v5876_v62, 0.0  ;;  %v5878_v9 = vmax.f32 %v4232_v7, 0.0  ;;  %1914 = vst [vmem:[%s4678_s21 + $0x8] sm:$0xff] %v2138_v23  ;;  %1915 = vst [vmem:[%s4678_s21 + $0x10] sm:$0xff] %v2139_v58 }
 0x376   : > { %v2144_v59 = vpack.c.bf16 %v5874_v0, %v5872_v49  ;;  %v5879_v19 = vmax.f32 %v5801_v38, 0.0  ;;  %v5880_v51 = vmax.f32 %v5802_v43, 0.0  ;;  %v5881_v10 = vmax.f32 %v5803_v63, 0.0  ;;  %1917 = vst [vmem:[%s4678_s21 + $0x20] sm:$0xff] %v2141_v12  ;;  %1918 = vst [vmem:[%s4678_s21 + $0x28] sm:$0xff] %v2142_v45 }
 0x377   : > { %v2145_v18 = vpack.c.bf16 %v5877_v37, %v5875_v20  ;;  %v5882_v57 = vmax.f32 %v5804_v47, 0.0  ;;  %v5883_v52 = vmax.f32 %v5805_v4, 0.0  ;;  %v5884_v7 = vmax.f32 %v5806_v8, 0.0  ;;  %1919 = vst [vmem:[%s4678_s21 + $0x30] sm:$0xff] %v2143_v39  ;;  %v5899_v39 = vld [vmem:[#allocation66_spill] sm:$0xff] }
 0x378   : > { %v2146_v13 = vpack.c.bf16 %v5879_v19, %v5878_v9  ;;  %v2147_v14 = vpack.c.bf16 %v5881_v10, %v5880_v51  ;;  %v5885_v38 = vmax.f32 %v5807_v17, 0.0  ;;  %v5886_v63 = vmax.f32 %v5808_v27, 0.0  ;;  %1920 = vst [vmem:[%s4678_s21 + $0x38] sm:$0xff] %v2144_v59 }
 0x379   : > { %v2148_v49 = vpack.c.bf16 %v5883_v52, %v5882_v57  ;;  %v5887_v47 = vmax.f32 %v4268_v36, 0.0  ;;  %v5888_v4 = vmax.f32 %v5809_v33, 0.0  ;;  %v5889_v22 = vmax.f32 %v4276_v15, 0.0  ;;  %1921 = vst [vmem:[%s4678_s21 + $0x40] sm:$0xff] %v2145_v18  ;;  %v5925_v52 = vld [vmem:[#allocation72_spill] sm:$0xff] }
 0x37a   : > { %v2149_v5 = vpack.c.bf16 %v5885_v38, %v5884_v7  ;;  %v5890_v58 = vmax.f32 %v4280_v53, 0.0  ;;  %v5892_v36 = vmax.f32 %v4288_v1, 0.0  ;;  %v5893_v8 = vmax.f32 %v4292_v11, 0.0  ;;  %1922 = vst [vmem:[%s4678_s21 + $0x48] sm:$0xff] %v2146_v13  ;;  %1923 = vst [vmem:[%s4678_s21 + $0x50] sm:$0xff] %v2147_v14  ;;  %v5927_v38 = vld [vmem:[#allocation2_spill] sm:$0xff] }
 0x37b   : > { %v2150_v43 = vpack.c.bf16 %v5887_v47, %v5886_v63  ;;  %v2151_v23 = vpack.c.bf16 %v5889_v22, %v5888_v4  ;;  %v5894_v15 = vmax.f32 %v4296_v60, 0.0  ;;  %v5895_v53 = vmax.f32 %v4300_v3, 0.0  ;;  %1924 = vst [vmem:[%s4678_s21 + $0x58] sm:$0xff] %v2148_v49  ;;  %v5929_v63 = vld [vmem:[#allocation8_spill] sm:$0xff]  ;;  %v5935_v22 = vld [vmem:[#allocation45_spill] sm:$0xff] }
 0x37c   : > { %v2152_v56 = vpack.c.bf16 %v5891_v6, %v5890_v58  ;;  %v2153_v27 = vpack.c.bf16 %v5893_v8, %v5892_v36  ;;  %v5897_v17 = vmax.f32 %v4308_v41, 0.0  ;;  %v5898_v45 = vmax.f32 %v4312_v2, 0.0  ;;  %1925 = vst [vmem:[%s4678_s21 + $0x60] sm:$0xff] %v2149_v5  ;;  %v5937_v6 = vld [vmem:[#allocation48_spill] sm:$0xff]  ;;  %v5939_v36 = vld [vmem:[#allocation47_spill] sm:$0xff] }
 0x37d   : > { %v2154_v33 = vpack.c.bf16 %v5895_v53, %v5894_v15  ;;  %v5900_v0 = vmax.f32 %v5899_v39, 0.0  ;;  %v5901_v1 = vmax.f32 %v4320_v26, 0.0  ;;  %v5902_v11 = vmax.f32 %v4324_v42, 0.0  ;;  %1926 = vst [vmem:[%s4678_s21 + $0x68] sm:$0xff] %v2150_v43  ;;  %1927 = vst [vmem:[%s4678_s21 + $0x70] sm:$0xff] %v2151_v23  ;;  %v5933_v43 = vld [vmem:[#allocation35_spill] sm:$0xff] }
 0x37e   : > { %v2155_v12 = vpack.c.bf16 %v5897_v17, %v5896_v30  ;;  %v5903_v3 = vmax.f32 %v4328_v32, 0.0  ;;  %v5904_v46 = vmax.f32 %v4332_v48, 0.0  ;;  %v5905_v2 = vmax.f32 %v4336_v29, 0.0  ;;  %1928 = vst [vmem:[%s4678_s21 + $0x78] sm:$0xff] %v2152_v56  ;;  %1929 = vst [vmem:[%s4678_s21 + $0x80] sm:$0xff] %v2153_v27  ;;  %v5941_v15 = vld [vmem:[#allocation49_spill] sm:$0xff] }
 0x37f   : > { %v2156_v59 = vpack.c.bf16 %v5900_v0, %v5898_v45  ;;  %v2157_v60 = vpack.c.bf16 %v5902_v11, %v5901_v1  ;;  %v5906_v20 = vmax.f32 %v4340_v31, 0.0  ;;  %v5907_v37 = vmax.f32 %v4344_v54, 0.0  ;;  %1930 = vst [vmem:[%s4678_s21 + $0x88] sm:$0xff] %v2154_v33  ;;  %v5943_v33 = vld [vmem:[#allocation50_spill] sm:$0xff]  ;;  %v5947_v39 = vld [vmem:[#allocation52_spill] sm:$0xff]  ;;  %v5951_v11 = vld [vmem:[#allocation7_spill] sm:$0xff] }
 0x380   : > { %v2158_v41 = vpack.c.bf16 %v5904_v46, %v5903_v3  ;;  %v5908_v18 = vmax.f32 %v4348_v50, 0.0  ;;  %v5909_v26 = vmax.f32 %v4352_v40, 0.0  ;;  %v5910_v42 = vmax.f32 %v4356_v24, 0.0  ;;  %1931 = vst [vmem:[%s4678_s21 + $0x90] sm:$0xff] %v2155_v12  ;;  %v5945_v12 = vld [vmem:[#allocation51_spill] sm:$0xff] }
 0x381   : > { %v2159_v62 = vpack.c.bf16 %v5906_v20, %v5905_v2  ;;  %v5911_v48 = vmax.f32 %v5810_v34, 0.0  ;;  %v5912_v29 = vmax.f32 %v4364_v28, 0.0  ;;  %v5913_v54 = vmax.f32 %v4368_v55, 0.0  ;;  %1932 = vst [vmem:[%s4678_s21 + $0x98] sm:$0xff] %v2156_v59  ;;  %v5919_v28 = vld [vmem:[#allocation69_spill] sm:$0xff]  ;;  %1933 = vst [vmem:[%s4678_s21 + $0xa0] sm:$0xff] %v2157_v60 }
 0x382   : > { %v2160_v9 = vpack.c.bf16 %v5908_v18, %v5907_v37  ;;  %v2161_v32 = vpack.c.bf16 %v5910_v42, %v5909_v26  ;;  %v5914_v50 = vmax.f32 %v4372_v35, 0.0  ;;  %v5915_v13 = vmax.f32 %v4376_v44, 0.0  ;;  %v5921_v35 = vld [vmem:[#allocation71_spill] sm:$0xff]  ;;  %1934 = vst [vmem:[%s4678_s21 + $0xa8] sm:$0xff] %v2158_v41  ;;  %v5954_v41 = vld [vmem:[#allocation10_spill] sm:$0xff]  ;;  %v5956_v20 = vld [vmem:[#allocation12_spill] sm:$0xff] }
 0x383   : > { %v2162_v31 = vpack.c.bf16 %v5912_v29, %v5911_v48  ;;  %v5916_v51 = vmax.f32 %v4380_v16, 0.0  ;;  %v5917_v34 = vmax.f32 %v4384_v25, 0.0  ;;  %v5918_v40 = vmax.f32 %v4388_v21, 0.0  ;;  %v5923_v16 = vld [vmem:[#allocation70_spill] sm:$0xff]  ;;  %1935 = vst [vmem:[%s4678_s21 + $0xb0] sm:$0xff] %v2159_v62  ;;  %v5958_v18 = vld [vmem:[#allocation11_spill] sm:$0xff] }
 0x384   : > { %v2163_v19 = vpack.c.bf16 %v5914_v50, %v5913_v54  ;;  %v5920_v55 = vmax.f32 %v5919_v28, 0.0  ;;  %v5922_v14 = vmax.f32 %v5921_v35, 0.0  ;;  %v5924_v57 = vmax.f32 %v5923_v16, 0.0  ;;  %1936 = vst [vmem:[%s4678_s21 + $0xb8] sm:$0xff] %v2160_v9  ;;  %1937 = vst [vmem:[%s4678_s21 + $0xc0] sm:$0xff] %v2161_v32  ;;  %v5960_v26 = vld [vmem:[#allocation13_spill] sm:$0xff] }
 0x385   : > { %v2164_v10 = vpack.c.bf16 %v5916_v51, %v5915_v13  ;;  %v2165_v24 = vpack.c.bf16 %v5918_v40, %v5917_v34  ;;  %v5926_v49 = vmax.f32 %v5925_v52, 0.0  ;;  %v5928_v5 = vmax.f32 %v5927_v38, 0.0  ;;  %1938 = vst [vmem:[%s4678_s21 + $0xc8] sm:$0xff] %v2162_v31  ;;  %v5962_v48 = vld [vmem:[#allocation14_spill] sm:$0xff]  ;;  %v5964_v31 = vld [vmem:[#allocation16_spill] sm:$0xff]  ;;  %v5968_v13 = vld [vmem:[#allocation17_spill] sm:$0xff] }
 0x386   : > { %v2166_v44 = vpack.c.bf16 %v5922_v14, %v5920_v55  ;;  %v5930_v47 = vmax.f32 %v5929_v63, 0.0  ;;  %v5934_v4 = vmax.f32 %v5933_v43, 0.0  ;;  %v5936_v23 = vmax.f32 %v5935_v22, 0.0  ;;  %1939 = vst [vmem:[%s4678_s21 + $0xd0] sm:$0xff] %v2163_v19  ;;  %v5970_v34 = vld [vmem:[#allocation18_spill] sm:$0xff]  ;;  %v5972_v28 = vld [vmem:[#allocation20_spill] sm:$0xff] }
 0x387   : > { %v2167_v7 = vpack.c.bf16 %v5926_v49, %v5924_v57  ;;  %v5938_v56 = vmax.f32 %v5937_v6, 0.0  ;;  %v5940_v8 = vmax.f32 %v5939_v36, 0.0  ;;  %v5942_v53 = vmax.f32 %v5941_v15, 0.0  ;;  %1940 = vst [vmem:[%s4678_s21 + $0xd8] sm:$0xff] %v2164_v10  ;;  %1941 = vst [vmem:[%s4678_s21 + $0xe0] sm:$0xff] %v2165_v24  ;;  %v5974_v14 = vld [vmem:[#allocation19_spill] sm:$0xff] }
 0x388   : > { %v2168_v25 = vpack.c.bf16 %v5930_v47, %v5928_v5  ;;  %v2169_v58 = vpack.c.bf16 %v5936_v23, %v5934_v4  ;;  %v5944_v30 = vmax.f32 %v5943_v33, 0.0  ;;  %v5946_v45 = vmax.f32 %v5945_v12, 0.0  ;;  %1942 = vst [vmem:[%s4678_s21 + $0xe8] sm:$0xff] %v2166_v44  ;;  %v5976_v57 = vld [vmem:[#allocation21_spill] sm:$0xff]  ;;  %v5978_v52 = vld [vmem:[#allocation22_spill] sm:$0xff]  ;;  %v5988_v36 = vld [vmem:[#allocation28_spill] sm:$0xff] }
 0x389   : > { %v2170_v27 = vpack.c.bf16 %v5940_v8, %v5938_v56  ;;  %v5948_v0 = vmax.f32 %v5947_v39, 0.0  ;;  %v5952_v60 = vmax.f32 %v5951_v11, 0.0  ;;  %v5953_v3 = vmax.f32 %v5815_v61, 0.0  ;;  %1943 = vst [vmem:[%s4678_s21 + $0xf0] sm:$0xff] %v2167_v7  ;;  %v5966_v61 = vld [vmem:[#allocation15_spill] sm:$0xff]  ;;  %v5980_v7 = vld [vmem:[#allocation24_spill] sm:$0xff] }
 0x38a   : > { %v2171_v17 = vpack.c.bf16 %v5944_v30, %v5942_v53  ;;  %v5955_v2 = vmax.f32 %v5954_v41, 0.0  ;;  %v5957_v62 = vmax.f32 %v5956_v20, 0.0  ;;  %v5959_v9 = vmax.f32 %v5958_v18, 0.0  ;;  %1944 = vst [vmem:[%s4678_s21 + $0xf8] sm:$0xff] %v2168_v25  ;;  %1945 = vst [vmem:[%s4678_s21 + $0x100] sm:$0xff] %v2169_v58  ;;  %v5982_v25 = vld [vmem:[#allocation23_spill] sm:$0xff] }
 0x38b   : > { %v2172_v59 = vpack.c.bf16 %v5948_v0, %v5946_v45  ;;  %v2173_v46 = vpack.c.bf16 %v5953_v3, %v5952_v60  ;;  %v5961_v42 = vmax.f32 %v5960_v26, 0.0  ;;  %v5963_v29 = vmax.f32 %v5962_v48, 0.0  ;;  %1946 = vst [vmem:[%s4678_s21 + $0x108] sm:$0xff] %v2170_v27  ;;  %v1970_v63 = vld [vmem:[%s4678_s21 + $0x190] sm:$0x33]  ;;  %v5984_v4 = vld [vmem:[#allocation25_spill] sm:$0xff] }
 0x38c   : > { %v2174_v37 = vpack.c.bf16 %v5957_v62, %v5955_v2  ;;  %v5965_v54 = vmax.f32 %v5964_v31, 0.0  ;;  %v5967_v19 = vmax.f32 %v5966_v61, 0.0  ;;  %v5969_v51 = vmax.f32 %v5968_v13, 0.0  ;;  %1947 = vst [vmem:[%s4678_s21 + $0x110] sm:$0xff] %v2171_v17  ;;  %v1973_v47 = vld [vmem:[%s4678_s21 + $0x198] sm:$0x33] }
 0x38d   : > { %v2175_v32 = vpack.c.bf16 %v5961_v42, %v5959_v9  ;;  %v5971_v40 = vmax.f32 %v5970_v34, 0.0  ;;  %v5973_v55 = vmax.f32 %v5972_v28, 0.0  ;;  %v5975_v16 = vmax.f32 %v5974_v14, 0.0  ;;  %1948 = vst [vmem:[%s4678_s21 + $0x118] sm:$0xff] %v2172_v59  ;;  %v5986_v6 = vld [vmem:[#allocation26_spill] sm:$0xff]  ;;  %v5990_v58 = vld [vmem:[#allocation27_spill] sm:$0xff] }
 0x38e   : > { %v2176_v50 = vpack.c.bf16 %v5965_v54, %v5963_v29  ;;  %v2177_v10 = vpack.c.bf16 %v5969_v51, %v5967_v19  ;;  %v5977_v24 = vmax.f32 %v5976_v57, 0.0  ;;  %v5979_v49 = vmax.f32 %v5978_v52, 0.0  ;;  %v5992_v53 = vld [vmem:[#allocation29_spill] sm:$0xff]  ;;  %v5994_v17 = vld [vmem:[#allocation30_spill] sm:$0xff]  ;;  %v5996_v45 = vld [vmem:[#allocation32_spill] sm:$0xff]  ;;  %1949 = vst [vmem:[%s4678_s21 + $0x120] sm:$0xff] %v2173_v46 }
 0x38f   : > { %v2178_v35 = vpack.c.bf16 %v5973_v55, %v5971_v40  ;;  %v5981_v38 = vmax.f32 %v5980_v7, 0.0  ;;  %v5983_v43 = vmax.f32 %v5982_v25, 0.0  ;;  %v5985_v22 = vmax.f32 %v5984_v4, 0.0  ;;  %1950 = vst [vmem:[%s4678_s21 + $0x128] sm:$0xff] %v2174_v37  ;;  %1951 = vst [vmem:[%s4678_s21 + $0x130] sm:$0xff] %v2175_v32  ;;  %v5998_v59 = vld [vmem:[#allocation31_spill] sm:$0xff] }
 0x390   : > { %v2179_v44 = vpack.c.bf16 %v5977_v24, %v5975_v16  ;;  %v5987_v56 = vmax.f32 %v5986_v6, 0.0  ;;  %v5989_v8 = vmax.f32 %v5988_v36, 0.0  ;;  %v5991_v27 = vmax.f32 %v5990_v58, 0.0  ;;  %1952 = vst [vmem:[%s4678_s21 + $0x138] sm:$0xff] %v2176_v50  ;;  %v6000_v60 = vld [vmem:[#allocation33_spill] sm:$0xff]  ;;  %v6002_v2 = vld [vmem:[#allocation34_spill] sm:$0xff] }
 0x391   : > { %v2180_v5 = vpack.c.bf16 %v5981_v38, %v5979_v49  ;;  %v2181_v23 = vpack.c.bf16 %v5985_v22, %v5983_v43  ;;  %v5993_v33 = vmax.f32 %v5992_v53, 0.0  ;;  %v5995_v12 = vmax.f32 %v5994_v17, 0.0  ;;  %v6004_v62 = vld [vmem:[#allocation36_spill] sm:$0xff]  ;;  %v6006_v18 = vld [vmem:[#allocation73_spill] sm:$0xff]  ;;  %v6008_v26 = vld [vmem:[#allocation74_spill] sm:$0xff]  ;;  %1953 = vst [vmem:[%s4678_s21 + $0x140] sm:$0xff] %v2177_v10 }
 0x392   : > { %v2182_v15 = vpack.c.bf16 %v5989_v8, %v5987_v56  ;;  %v5997_v39 = vmax.f32 %v5996_v45, 0.0  ;;  %v5999_v11 = vmax.f32 %v5998_v59, 0.0  ;;  %v6001_v3 = vmax.f32 %v6000_v60, 0.0  ;;  %v6010_v48 = vld [vmem:[#allocation75_spill] sm:$0xff]  ;;  %v6012_v31 = vld [vmem:[#allocation76_spill] sm:$0xff]  ;;  %1954 = vst [vmem:[%s4678_s21 + $0x148] sm:$0xff] %v2178_v35 }
 0x393   : > { %v2183_v30 = vpack.c.bf16 %v5993_v33, %v5991_v27  ;;  %v6003_v20 = vmax.f32 %v6002_v2, 0.0  ;;  %v6005_v46 = vmax.f32 %v6004_v62, 0.0  ;;  %v6007_v9 = vmax.f32 %v6006_v18, 0.0  ;;  %1955 = vst [vmem:[%s4678_s21 + $0x150] sm:$0xff] %v2179_v44  ;;  %1956 = vst [vmem:[%s4678_s21 + $0x158] sm:$0xff] %v2180_v5 }
 0x394   : > { %v2184_v0 = vpack.c.bf16 %v5997_v39, %v5995_v12  ;;  %v2185_v41 = vpack.c.bf16 %v6001_v3, %v5999_v11  ;;  %v6009_v42 = vmax.f32 %v6008_v26, 0.0  ;;  %v6011_v29 = vmax.f32 %v6010_v48, 0.0  ;;  %1957 = vst [vmem:[%s4678_s21 + $0x160] sm:$0xff] %v2181_v23  ;;  %1958 = vst [vmem:[%s4678_s21 + $0x168] sm:$0xff] %v2182_v15 }
 0x395   : > { %v2186_v37 = vpack.c.bf16 %v6005_v46, %v6003_v20  ;;  %v6013_v54 = vmax.f32 %v6012_v31, 0.0  ;;  %1959 = vst [vmem:[%s4678_s21 + $0x170] sm:$0xff] %v2183_v30 }
 0x396   : > { %v2187_v32 = vpack.c.bf16 %v6009_v42, %v6007_v9  ;;  %1960 = vst [vmem:[%s4678_s21 + $0x178] sm:$0xff] %v2184_v0  ;;  %1961 = vst [vmem:[%s4678_s21 + $0x180] sm:$0xff] %v2185_v41 }
 0x397   : > { %v2188_v50 = vpack.c.bf16 %v6013_v54, %v6011_v29  ;;  %1962 = vst [vmem:[%s4678_s21 + $0x188] sm:$0xff] %v2186_v37 }
 0x398   : > { %v1971_v61 = vsel %vm1969_vm9, %v2187_v32, %v1970_v63 }
 0x399   : > { %v1974_v19 = vsel %vm1969_vm9, %v2188_v50, %v1973_v47  ;;  %1972 = vst [vmem:[%s4678_s21 + $0x190] sm:$0x33] %v1971_v61 }
 0x39a   : > { %1975 = vst [vmem:[%s4678_s21 + $0x198] sm:$0x33] %v1974_v19 }
 0x39b PF: > { %s14_s15 = sadd.s32 1, %s2234_s15  }
 0x39c   : > { %p11_p4 = scmp.ge.s32.totalorder %s14_s15, 4  }
 0x39e   :  { %13 = sbr.rel (!%p11_p4) target bundleno = 1 (0x1), region = 66 }

</bundles_post_ra>
